<compile_context>
chip_gen: v7x
topology: tpu7x:2x2x1
jax: 0.10.0
libtpu: 0.0.40
codegen_flags: <defaults>
</compile_context>

<pallas_src>
import functools
import math

import jax
import jax.numpy as jnp
from jax.experimental import pallas as pl
from jax.experimental.pallas import tpu as pltpu


def _mha_kernel(q_ref, k_ref, v_ref, bias_ref,
                wq_ref, bq_ref, wk_ref, bk_ref, wv_ref, bv_ref,
                wo_ref, bo_ref,
                out_ref,
                kT_scr, v_scr,
                *, h: int, d_k: int, n_k: int, tk: int, scale: float):
    """Grid = (B, n_q).  Block shapes:
         q_ref    (1, tq, D)  bf16        k_ref / v_ref (1, S, D) bf16
         bias_ref (1, n_k, tq, tk) bf16   additive mask bias (0 keep / -1e9 masked)
         wq/wk/wv/wo (D, D)   bf16        bq/bk/bv/bo   (1, D)    f32
         out_ref  (1, tq, D)
       Scratch (persistent across the q-tiles of one batch element):
         kT_scr (n_k, h, d_k, tk) bf16    projected K, transposed per head
         v_scr  (n_k, h, tk, d_k) bf16    projected V, head-split
    """
    f32, bf16 = jnp.float32, jnp.bfloat16
    qi = pl.program_id(1)
    tq, D = q_ref.shape[1], q_ref.shape[2]

    # ---- K / V projection: once per batch element (qi == 0), as fused
    #      (tk, D) @ (D, D) GEMMs (full MXU width); head split + K transpose done
    #      once per k-tile and cached in VMEM scratch for all query tiles.
    @pl.when(qi == 0)
    def _():
        def project(j):
            r0 = j * tk
            if not isinstance(j, int):
                r0 = pl.multiple_of(r0, tk)
            Kp = jnp.dot(k_ref[0, pl.ds(r0, tk), :], wk_ref[...],
                         preferred_element_type=f32) + bk_ref[...]        # (tk, D)
            Vp = jnp.dot(v_ref[0, pl.ds(r0, tk), :], wv_ref[...],
                         preferred_element_type=f32) + bv_ref[...]        # (tk, D)
            kT_scr[j] = Kp.T.reshape(h, d_k, tk).astype(bf16)             # (h, d_k, tk)
            v_scr[j] = Vp.reshape(tk, h, d_k).transpose(1, 0, 2).astype(bf16)

        if n_k == 1:
            project(0)
        else:
            pl.loop(0, n_k)(project)

    # ---- Q projection for this query tile: one (tq, D) @ (D, D) GEMM; fold the
    #      1/sqrt(d_k) scale into Q once; split heads afterwards.
    Qp = jnp.dot(q_ref[0], wq_ref[...], preferred_element_type=f32) + bq_ref[...]
    Qh = (Qp * scale).reshape(tq, h, d_k).transpose(1, 0, 2).astype(bf16)  # (h, tq, d_k)

    # ---- Online (flash-style) softmax over k-tiles; VMEM use independent of S.
    def kv_step(j, carry):
        m_prev, l_prev, acc_prev = carry
        s = jnp.einsum('hqd,hdk->hqk', Qh, kT_scr[j],
                       preferred_element_type=f32)                         # (h, tq, tk)
        s = s + bias_ref[0, j].astype(f32)[None, :, :]                     # mask bias
        m_new = jnp.maximum(m_prev, jnp.max(s, axis=-1, keepdims=True))
        alpha = jnp.exp(m_prev - m_new)
        p = jnp.exp(s - m_new)
        l_new = alpha * l_prev + jnp.sum(p, axis=-1, keepdims=True)
        acc_new = alpha * acc_prev + jnp.einsum(
            'hqk,hkd->hqd', p.astype(bf16), v_scr[j],
            preferred_element_type=f32)                                    # (h, tq, d_k)
        return m_new, l_new, acc_new

    carry0 = (jnp.full((h, tq, 1), -1e30, f32),
              jnp.zeros((h, tq, 1), f32),
              jnp.zeros((h, tq, d_k), f32))
    if n_k == 1:
        _, l_f, acc = kv_step(0, carry0)
    else:
        _, l_f, acc = jax.lax.fori_loop(0, n_k, kv_step, carry0, unroll=(n_k <= 4))

    # TODO(synk): training-mode dropout on the attention probabilities is not
    # implemented (inference semantics: dropout == identity).

    # ---- Normalize (EUP approx reciprocal), concat heads, single fused output GEMM.
    ctx = acc * pl.reciprocal(l_f, approx=True)                            # (h, tq, d_k)
    ctx = ctx.transpose(1, 0, 2).reshape(tq, h * d_k).astype(bf16)         # (tq, D)
    out = jnp.dot(ctx, wo_ref[...], preferred_element_type=f32) + bo_ref[...]
    out_ref[0] = out.astype(out_ref.dtype)


def _pick_tile(s: int, target: int) -> int:
    if s <= target:
        return s
    t = (target // 8) * 8
    while t >= 8:
        if s % t == 0:
            return t
        t -= 8
    return s


def _const_spec(shape):
    """Grid-invariant block (weights/biases): same block for every grid point and
    single-buffered — double-buffering a never-changing block just wastes VMEM."""
    index_map = lambda b, i: (0,) * len(shape)
    try:
        return pl.BlockSpec(shape, index_map, pipeline_mode=pl.Buffered(1))
    except TypeError:  # older jax without pipeline_mode support
        return pl.BlockSpec(shape, index_map)


def multi_head_attention(q, k, v, mask, params, *, h: int,
                         tq=None, tk=None,
                         out_dtype=jnp.float32,
                         vmem_limit_bytes=48 * 1024 * 1024):
    """Forward pass of MultiHeadAttentionBlock (inference; dropout = identity).

    params = (wq_t, bq, wk_t, bk, wv_t, bv, wo_t, bo) with weights pre-transposed
    to (in, out) so that y = x @ W_t + b matches nn.Linear.
    """
    B, S, D = q.shape
    assert D % h == 0, "d_model is not divisible by h"
    d_k = D // h
    wq_t, bq, wk_t, bk, wv_t, bv, wo_t, bo = params

    tq = _pick_tile(S, 256) if tq is None else tq
    tk = _pick_tile(S, 512) if tk is None else tk
    assert S % tq == 0 and S % tk == 0, "S must be divisible by the q/k tiles"
    n_q, n_k = S // tq, S // tk

    bf16, f32 = jnp.bfloat16, jnp.float32
    q_bf, k_bf, v_bf = (x.astype(bf16) for x in (q, k, v))
    wq_b, wk_b, wv_b, wo_b = (w.astype(bf16) for w in (wq_t, wk_t, wv_t, wo_t))
    bq_2, bk_2, bv_2, bo_2 = (b.reshape(1, D).astype(f32) for b in (bq, bk, bv, bo))

    # Mask -> additive bf16 bias (0 keep, -1e9 masked), pre-tiled so the kernel's
    # k-loop indexes it only by a leading dim (no lane-dim dynamic slices).
    m = jnp.asarray(mask)
    if m.ndim == 4:
        assert m.shape[1] == 1, "per-head masks are not supported by this kernel"
        m = m[:, 0]
    m = jnp.broadcast_to(m, (B, S, S))
    bias = jnp.where(m == 0, jnp.float32(-1e9), jnp.float32(0.0)).astype(bf16)
    bias = bias.reshape(B, n_q, tq, n_k, tk).transpose(0, 1, 3, 2, 4)
    bias = bias.reshape(B, n_q * n_k, tq, tk)

    kernel = functools.partial(_mha_kernel, h=h, d_k=d_k, n_k=n_k, tk=tk,
                               scale=1.0 / math.sqrt(d_k))

    q_spec = pl.BlockSpec((1, tq, D), lambda b, i: (b, i, 0))
    kv_spec = pl.BlockSpec((1, S, D), lambda b, i: (b, 0, 0))  # re-fetched only when b changes
    bias_spec = pl.BlockSpec((1, n_k, tq, tk), lambda b, i: (b, i, 0, 0))
    w_spec = _const_spec((D, D))
    b_spec = _const_spec((1, D))
    out_spec = pl.BlockSpec((1, tq, D), lambda b, i: (b, i, 0))

    grid_spec = pltpu.PrefetchScalarGridSpec(
        num_scalar_prefetch=0,
        grid=(B, n_q),
        in_specs=[q_spec, kv_spec, kv_spec, bias_spec,
                  w_spec, b_spec, w_spec, b_spec, w_spec, b_spec,
                  w_spec, b_spec],
        out_specs=out_spec,
        scratch_shapes=[pltpu.VMEM((n_k, h, d_k, tk), bf16),   # projected K^T, per k-tile
                        pltpu.VMEM((n_k, h, tk, d_k), bf16)],  # projected V, per k-tile
    )

    return pl.pallas_call(
        kernel,
        out_shape=jax.ShapeDtypeStruct((B, S, D), out_dtype),
        grid_spec=grid_spec,
        compiler_params=pltpu.CompilerParams(
            dimension_semantics=("parallel", "arbitrary"),
            # 48 MiB leaves headroom on v7x (64 MiB physical VMEM); on v5e/v6e
            # (128 MiB) raise toward ~96 MiB and sweep tq/tk upward.
            vmem_limit_bytes=vmem_limit_bytes,
        ),
    )(q_bf, k_bf, v_bf, bias,
      wq_b, bq_2, wk_b, bk_2, wv_b, bv_2, wo_b, bo_2)


def _reference(q, k, v, mask, params, *, h: int):
    # Pure-JAX mirror of the PyTorch forward (dropout = identity) with the same
    # bf16-matmul / f32-accumulation precision as the kernel.
    B, S, D = q.shape
    d_k = D // h
    wq_t, bq, wk_t, bk, wv_t, bv, wo_t, bo = params
    bf16, f32 = jnp.bfloat16, jnp.float32

    def proj(x, w_t, b):
        return jnp.dot(x.astype(bf16), w_t.astype(bf16),
                       preferred_element_type=f32) + b

    Q = proj(q, wq_t, bq) / math.sqrt(d_k)
    K = proj(k, wk_t, bk)
    V = proj(v, wv_t, bv)
    Qh = Q.reshape(B, S, h, d_k).transpose(0, 2, 1, 3).astype(bf16)
    Kh = K.reshape(B, S, h, d_k).transpose(0, 2, 1, 3).astype(bf16)
    Vh = V.reshape(B, S, h, d_k).transpose(0, 2, 1, 3).astype(bf16)
    scores = jnp.einsum('bhqd,bhkd->bhqk', Qh, Kh, preferred_element_type=f32)
    scores = jnp.where(mask == 0, -1e9, scores)
    p = jax.nn.softmax(scores, axis=-1)
    x = jnp.einsum('bhqk,bhkd->bhqd', p.astype(bf16), Vh, preferred_element_type=f32)
    x = x.transpose(0, 2, 1, 3).reshape(B, S, D).astype(bf16)
    return jnp.dot(x, wo_t.astype(bf16), preferred_element_type=f32) + bo


if __name__ == "__main__":
    B, S, d_model, h = 2, 8, 32, 4
    key = jax.random.PRNGKey(0)
    ks = jax.random.split(key, 11)

    # Deterministic parameter init (PyTorch nn.Linear shapes: W (out, in), b (out,)).
    def lin(kw, kb):
        bound = 1.0 / math.sqrt(d_model)
        W = jax.random.uniform(kw, (d_model, d_model), jnp.float32, -bound, bound)
        b = jax.random.uniform(kb, (d_model,), jnp.float32, -bound, bound)
        return W.T, b   # stored transposed (in, out): y = x @ W_t + b == nn.Linear

    wq_t, bq = lin(ks[0], ks[1])
    wk_t, bk = lin(ks[2], ks[3])
    wv_t, bv = lin(ks[4], ks[5])
    wo_t, bo = lin(ks[6], ks[7])
    params = (wq_t, bq, wk_t, bk, wv_t, bv, wo_t, bo)

    q = jax.random.normal(ks[8], (B, S, d_model), jnp.float32)
    k = jax.random.normal(ks[9], (B, S, d_model), jnp.float32)
    v = jax.random.normal(ks[10], (B, S, d_model), jnp.float32)
    # Causal mask, broadcast over heads: (B, 1, S, S), 0 => masked.
    mask = jnp.broadcast_to(
        jnp.tril(jnp.ones((S, S), jnp.int32))[None, None], (B, 1, S, S))

    out = multi_head_attention(q, k, v, mask, params, h=h)
    out = jax.block_until_ready(out)

    ref = _reference(q, k, v, mask, params, h=h)
    assert out.shape == (B, S, d_model)
    # Tolerance covers bf16 matmul rounding + approximate softmax reciprocal.
    assert jnp.allclose(out, ref, atol=2e-2, rtol=2e-2), "mismatch vs reference"
    print("KERNEL_OK")
</pallas_src>

<mosaic_0001>
module attributes {stable_mosaic.version = 11 : i64} {
  func.func @_mha_kernel(%arg0: i32, %arg1: i32, %arg2: memref<1x8x32xbf16, #tpu.memory_space<vmem>>, %arg3: memref<1x8x32xbf16, #tpu.memory_space<vmem>>, %arg4: memref<1x8x32xbf16, #tpu.memory_space<vmem>>, %arg5: memref<1x1x8x8xbf16, #tpu.memory_space<vmem>>, %arg6: memref<32x32xbf16, #tpu.memory_space<vmem>>, %arg7: memref<1x32xf32, #tpu.memory_space<vmem>>, %arg8: memref<32x32xbf16, #tpu.memory_space<vmem>>, %arg9: memref<1x32xf32, #tpu.memory_space<vmem>>, %arg10: memref<32x32xbf16, #tpu.memory_space<vmem>>, %arg11: memref<1x32xf32, #tpu.memory_space<vmem>>, %arg12: memref<32x32xbf16, #tpu.memory_space<vmem>>, %arg13: memref<1x32xf32, #tpu.memory_space<vmem>>, %arg14: memref<1x8x32xf32, #tpu.memory_space<vmem>>, %arg15: memref<1x4x8x8xbf16, #tpu.memory_space<vmem>>, %arg16: memref<1x4x8x8xbf16, #tpu.memory_space<vmem>>) attributes {dimension_semantics = [#tpu.dimension_semantics<parallel>, #tpu.dimension_semantics<arbitrary>], iteration_bounds = array<i64: 2, 1>, scalar_prefetch = 0 : i64, scratch_operands = 2 : i64, tpu.core_type = #tpu.core_type<tc>, window_params = [{transform_indices = @transform_0, window_bounds = array<i64: 1, 8, 32>}, {transform_indices = @transform_1, window_bounds = array<i64: 1, 8, 32>}, {transform_indices = @transform_2, window_bounds = array<i64: 1, 8, 32>}, {transform_indices = @transform_3, window_bounds = array<i64: 1, 1, 8, 8>}, {pipeline_mode = #tpu.pipeline_mode<synchronous>, transform_indices = @transform_4, window_bounds = array<i64: 32, 32>}, {pipeline_mode = #tpu.pipeline_mode<synchronous>, transform_indices = @transform_5, window_bounds = array<i64: 1, 32>}, {pipeline_mode = #tpu.pipeline_mode<synchronous>, transform_indices = @transform_6, window_bounds = array<i64: 32, 32>}, {pipeline_mode = #tpu.pipeline_mode<synchronous>, transform_indices = @transform_7, window_bounds = array<i64: 1, 32>}, {pipeline_mode = #tpu.pipeline_mode<synchronous>, transform_indices = @transform_8, window_bounds = array<i64: 32, 32>}, {pipeline_mode = #tpu.pipeline_mode<synchronous>, transform_indices = @transform_9, window_bounds = array<i64: 1, 32>}, {pipeline_mode = #tpu.pipeline_mode<synchronous>, transform_indices = @transform_10, window_bounds = array<i64: 32, 32>}, {pipeline_mode = #tpu.pipeline_mode<synchronous>, transform_indices = @transform_11, window_bounds = array<i64: 1, 32>}, {transform_indices = @transform_12, window_bounds = array<i64: 1, 8, 32>}]} {
    %c0_i32 = arith.constant 0 : i32
    %0 = arith.cmpi eq, %arg1, %c0_i32 : i32
    %1 = arith.extui %0 : i1 to i32
    %c0_i32_0 = arith.constant 0 : i32
    %2 = arith.cmpi ne, %1, %c0_i32_0 : i32
    scf.if %2 {
      %c0_35 = arith.constant 0 : index
      %c0_36 = arith.constant 0 : index
      %c0_37 = arith.constant 0 : index
      %60 = vector.load %arg3[%c0_35, %c0_36, %c0_37] : memref<1x8x32xbf16, #tpu.memory_space<vmem>>, vector<1x8x32xbf16>
      %61 = vector.shape_cast %60 : vector<1x8x32xbf16> to vector<8x32xbf16>
      %c0_38 = arith.constant 0 : index
      %c0_39 = arith.constant 0 : index
      %62 = vector.load %arg8[%c0_38, %c0_39] : memref<32x32xbf16, #tpu.memory_space<vmem>>, vector<32x32xbf16>
      %cst_40 = arith.constant dense<0.000000e+00> : vector<8x32xf32>
      %63 = tpu.matmul %61, %62, %cst_40 {dimension_numbers = #tpu.dot_dimension_numbers<[1], [0], [0], [1], [0, 0, 1, 1], [], []>} : vector<8x32xbf16>, vector<32x32xbf16>, vector<8x32xf32> -> vector<8x32xf32>
      %c0_41 = arith.constant 0 : index
      %c0_42 = arith.constant 0 : index
      %64 = vector.load %arg9[%c0_41, %c0_42] : memref<1x32xf32, #tpu.memory_space<vmem>>, vector<1x32xf32>
      %65 = vector.broadcast %64 : vector<1x32xf32> to vector<8x32xf32>
      %66 = arith.addf %63, %65 : vector<8x32xf32>
      %c0_43 = arith.constant 0 : index
      %c0_44 = arith.constant 0 : index
      %c0_45 = arith.constant 0 : index
      %67 = vector.load %arg4[%c0_43, %c0_44, %c0_45] : memref<1x8x32xbf16, #tpu.memory_space<vmem>>, vector<1x8x32xbf16>
      %68 = vector.shape_cast %67 : vector<1x8x32xbf16> to vector<8x32xbf16>
      %c0_46 = arith.constant 0 : index
      %c0_47 = arith.constant 0 : index
      %69 = vector.load %arg10[%c0_46, %c0_47] : memref<32x32xbf16, #tpu.memory_space<vmem>>, vector<32x32xbf16>
      %cst_48 = arith.constant dense<0.000000e+00> : vector<8x32xf32>
      %70 = tpu.matmul %68, %69, %cst_48 {dimension_numbers = #tpu.dot_dimension_numbers<[1], [0], [0], [1], [0, 0, 1, 1], [], []>} : vector<8x32xbf16>, vector<32x32xbf16>, vector<8x32xf32> -> vector<8x32xf32>
      %c0_49 = arith.constant 0 : index
      %c0_50 = arith.constant 0 : index
      %71 = vector.load %arg11[%c0_49, %c0_50] : memref<1x32xf32, #tpu.memory_space<vmem>>, vector<1x32xf32>
      %72 = vector.broadcast %71 : vector<1x32xf32> to vector<8x32xf32>
      %73 = arith.addf %70, %72 : vector<8x32xf32>
      %74 = tpu.transpose %66, [1, 0] : vector<8x32xf32> -> vector<32x8xf32>
      %75 = vector.shape_cast %74 : vector<32x8xf32> to vector<4x8x8xf32>
      %76 = arith.truncf %75 : vector<4x8x8xf32> to vector<4x8x8xbf16>
      %c0_51 = arith.constant 0 : index
      %c0_52 = arith.constant 0 : index
      %c0_53 = arith.constant 0 : index
      %c0_54 = arith.constant 0 : index
      %77 = vector.load %arg15[%c0_51, %c0_52, %c0_53, %c0_54] : memref<1x4x8x8xbf16, #tpu.memory_space<vmem>>, vector<1x4x8x8xbf16>
      %78 = vector.shape_cast %77 : vector<1x4x8x8xbf16> to vector<4x8x8xbf16>
      %79 = vector.shape_cast %76 : vector<4x8x8xbf16> to vector<1x4x8x8xbf16>
      tpu.vector_store %arg15[%c0_51, %c0_52, %c0_53, %c0_54], %79 {strides = array<i32>} : memref<1x4x8x8xbf16, #tpu.memory_space<vmem>>, vector<1x4x8x8xbf16>,
      %80 = vector.shape_cast %73 : vector<8x32xf32> to vector<8x4x8xf32>
      %81 = tpu.transpose %80, [1, 0, 2] : vector<8x4x8xf32> -> vector<4x8x8xf32>
      %82 = arith.truncf %81 : vector<4x8x8xf32> to vector<4x8x8xbf16>
      %c0_55 = arith.constant 0 : index
      %c0_56 = arith.constant 0 : index
      %c0_57 = arith.constant 0 : index
      %c0_58 = arith.constant 0 : index
      %83 = vector.load %arg16[%c0_55, %c0_56, %c0_57, %c0_58] : memref<1x4x8x8xbf16, #tpu.memory_space<vmem>>, vector<1x4x8x8xbf16>
      %84 = vector.shape_cast %83 : vector<1x4x8x8xbf16> to vector<4x8x8xbf16>
      %85 = vector.shape_cast %82 : vector<4x8x8xbf16> to vector<1x4x8x8xbf16>
      tpu.vector_store %arg16[%c0_55, %c0_56, %c0_57, %c0_58], %85 {strides = array<i32>} : memref<1x4x8x8xbf16, #tpu.memory_space<vmem>>, vector<1x4x8x8xbf16>,
    } else {
    }
    %c0 = arith.constant 0 : index
    %c0_1 = arith.constant 0 : index
    %c0_2 = arith.constant 0 : index
    %3 = vector.load %arg2[%c0, %c0_1, %c0_2] : memref<1x8x32xbf16, #tpu.memory_space<vmem>>, vector<1x8x32xbf16>
    %4 = vector.shape_cast %3 : vector<1x8x32xbf16> to vector<8x32xbf16>
    %c0_3 = arith.constant 0 : index
    %c0_4 = arith.constant 0 : index
    %5 = vector.load %arg6[%c0_3, %c0_4] : memref<32x32xbf16, #tpu.memory_space<vmem>>, vector<32x32xbf16>
    %cst = arith.constant dense<0.000000e+00> : vector<8x32xf32>
    %6 = tpu.matmul %4, %5, %cst {dimension_numbers = #tpu.dot_dimension_numbers<[1], [0], [0], [1], [0, 0, 1, 1], [], []>} : vector<8x32xbf16>, vector<32x32xbf16>, vector<8x32xf32> -> vector<8x32xf32>
    %c0_5 = arith.constant 0 : index
    %c0_6 = arith.constant 0 : index
    %7 = vector.load %arg7[%c0_5, %c0_6] : memref<1x32xf32, #tpu.memory_space<vmem>>, vector<1x32xf32>
    %8 = vector.broadcast %7 : vector<1x32xf32> to vector<8x32xf32>
    %9 = arith.addf %6, %8 : vector<8x32xf32>
    %cst_7 = arith.constant 0.353553385 : f32
    %10 = vector.broadcast %cst_7 : f32 to vector<8x32xf32>
    %11 = arith.mulf %9, %10 : vector<8x32xf32>
    %12 = vector.shape_cast %11 : vector<8x32xf32> to vector<8x4x8xf32>
    %13 = tpu.transpose %12, [1, 0, 2] : vector<8x4x8xf32> -> vector<4x8x8xf32>
    %14 = arith.truncf %13 : vector<4x8x8xf32> to vector<4x8x8xbf16>
    %cst_8 = arith.constant -1.000000e+30 : f32
    %15 = vector.broadcast %cst_8 : f32 to vector<4x8x1xf32>
    %cst_9 = arith.constant 0.000000e+00 : f32
    %16 = vector.broadcast %cst_9 : f32 to vector<4x8x1xf32>
    %cst_10 = arith.constant 0.000000e+00 : f32
    %17 = vector.broadcast %cst_10 : f32 to vector<4x8x8xf32>
    %c0_11 = arith.constant 0 : index
    %c0_12 = arith.constant 0 : index
    %c0_13 = arith.constant 0 : index
    %c0_14 = arith.constant 0 : index
    %18 = vector.load %arg15[%c0_11, %c0_12, %c0_13, %c0_14] : memref<1x4x8x8xbf16, #tpu.memory_space<vmem>>, vector<1x4x8x8xbf16>
    %19 = vector.shape_cast %18 : vector<1x4x8x8xbf16> to vector<4x8x8xbf16>
    "tpu.trace_start"() <{level = 10 : i32, message = "hqd,hdk->hqk"}> : () -> ()
    %cst_15 = arith.constant dense<0.000000e+00> : vector<4x8x8xf32>
    %20 = tpu.matmul %14, %19, %cst_15 {dimension_numbers = #tpu.dot_dimension_numbers<[2], [1], [1], [2], [0, 0, 0, 1, 1, 2], [0], [0]>} : vector<4x8x8xbf16>, vector<4x8x8xbf16>, vector<4x8x8xf32> -> vector<4x8x8xf32>
    "tpu.trace_stop"() : () -> ()
    %c0_16 = arith.constant 0 : index
    %c0_17 = arith.constant 0 : index
    %c0_18 = arith.constant 0 : index
    %c0_19 = arith.constant 0 : index
    %21 = vector.load %arg5[%c0_16, %c0_17, %c0_18, %c0_19] : memref<1x1x8x8xbf16, #tpu.memory_space<vmem>>, vector<1x1x8x8xbf16>
    %22 = vector.shape_cast %21 : vector<1x1x8x8xbf16> to vector<8x8xbf16>
    %23 = arith.extf %22 : vector<8x8xbf16> to vector<8x8xf32>
    %24 = vector.shape_cast %23 : vector<8x8xf32> to vector<1x8x8xf32>
    %25 = vector.broadcast %24 : vector<1x8x8xf32> to vector<4x8x8xf32>
    %26 = arith.addf %20, %25 : vector<4x8x8xf32>
    %cst_20 = arith.constant dense<0xFF800000> : vector<4x8xf32>
    %27 = vector.multi_reduction <maximumf>, %26, %cst_20 [2] : vector<4x8x8xf32> to vector<4x8xf32>
    %28 = vector.shape_cast %27 : vector<4x8xf32> to vector<4x8x1xf32>
    %29 = arith.maximumf %15, %28 : vector<4x8x1xf32>
    %30 = arith.subf %15, %29 : vector<4x8x1xf32>
    %31 = math.exp %30 : vector<4x8x1xf32>
    %32 = vector.broadcast %29 : vector<4x8x1xf32> to vector<4x8x8xf32>
    %33 = arith.subf %26, %32 : vector<4x8x8xf32>
    %34 = math.exp %33 : vector<4x8x8xf32>
    %35 = arith.mulf %31, %16 : vector<4x8x1xf32>
    %cst_21 = arith.constant dense<0.000000e+00> : vector<4x8xf32>
    %36 = vector.multi_reduction <add>, %34, %cst_21 [2] : vector<4x8x8xf32> to vector<4x8xf32>
    %37 = vector.shape_cast %36 : vector<4x8xf32> to vector<4x8x1xf32>
    %38 = arith.addf %35, %37 : vector<4x8x1xf32>
    %39 = vector.broadcast %31 : vector<4x8x1xf32> to vector<4x8x8xf32>
    %40 = arith.mulf %39, %17 : vector<4x8x8xf32>
    %41 = arith.truncf %34 : vector<4x8x8xf32> to vector<4x8x8xbf16>
    %c0_22 = arith.constant 0 : index
    %c0_23 = arith.constant 0 : index
    %c0_24 = arith.constant 0 : index
    %c0_25 = arith.constant 0 : index
    %42 = vector.load %arg16[%c0_22, %c0_23, %c0_24, %c0_25] : memref<1x4x8x8xbf16, #tpu.memory_space<vmem>>, vector<1x4x8x8xbf16>
    %43 = vector.shape_cast %42 : vector<1x4x8x8xbf16> to vector<4x8x8xbf16>
    "tpu.trace_start"() <{level = 10 : i32, message = "hqk,hkd->hqd"}> : () -> ()
    %cst_26 = arith.constant dense<0.000000e+00> : vector<4x8x8xf32>
    %44 = tpu.matmul %41, %43, %cst_26 {dimension_numbers = #tpu.dot_dimension_numbers<[2], [1], [1], [2], [0, 0, 0, 1, 1, 2], [0], [0]>} : vector<4x8x8xbf16>, vector<4x8x8xbf16>, vector<4x8x8xf32> -> vector<4x8x8xf32>
    "tpu.trace_stop"() : () -> ()
    %45 = arith.addf %40, %44 : vector<4x8x8xf32>
    %46 = tpu.reciprocal %38 {approx = true} : vector<4x8x1xf32> -> vector<4x8x1xf32>
    %47 = vector.broadcast %46 : vector<4x8x1xf32> to vector<4x8x8xf32>
    %48 = arith.mulf %45, %47 : vector<4x8x8xf32>
    %49 = tpu.transpose %48, [1, 0, 2] : vector<4x8x8xf32> -> vector<8x4x8xf32>
    %50 = vector.shape_cast %49 : vector<8x4x8xf32> to vector<8x32xf32>
    %51 = arith.truncf %50 : vector<8x32xf32> to vector<8x32xbf16>
    %c0_27 = arith.constant 0 : index
    %c0_28 = arith.constant 0 : index
    %52 = vector.load %arg12[%c0_27, %c0_28] : memref<32x32xbf16, #tpu.memory_space<vmem>>, vector<32x32xbf16>
    %cst_29 = arith.constant dense<0.000000e+00> : vector<8x32xf32>
    %53 = tpu.matmul %51, %52, %cst_29 {dimension_numbers = #tpu.dot_dimension_numbers<[1], [0], [0], [1], [0, 0, 1, 1], [], []>} : vector<8x32xbf16>, vector<32x32xbf16>, vector<8x32xf32> -> vector<8x32xf32>
    %c0_30 = arith.constant 0 : index
    %c0_31 = arith.constant 0 : index
    %54 = vector.load %arg13[%c0_30, %c0_31] : memref<1x32xf32, #tpu.memory_space<vmem>>, vector<1x32xf32>
    %55 = vector.broadcast %54 : vector<1x32xf32> to vector<8x32xf32>
    %56 = arith.addf %53, %55 : vector<8x32xf32>
    %c0_32 = arith.constant 0 : index
    %c0_33 = arith.constant 0 : index
    %c0_34 = arith.constant 0 : index
    %57 = vector.load %arg14[%c0_32, %c0_33, %c0_34] : memref<1x8x32xf32, #tpu.memory_space<vmem>>, vector<1x8x32xf32>
    %58 = vector.shape_cast %57 : vector<1x8x32xf32> to vector<8x32xf32>
    %59 = vector.shape_cast %56 : vector<8x32xf32> to vector<1x8x32xf32>
    tpu.vector_store %arg14[%c0_32, %c0_33, %c0_34], %59 {strides = array<i32>} : memref<1x8x32xf32, #tpu.memory_space<vmem>>, vector<1x8x32xf32>,
    return
  }
  func.func @transform_0(%arg0: i32, %arg1: i32) -> (i32, i32, i32) {
    %c0_i32 = arith.constant 0 : i32
    %c0_i32_0 = arith.constant 0 : i32
    return %arg0, %arg1, %c0_i32 : i32, i32, i32
  }
  func.func @transform_1(%arg0: i32, %arg1: i32) -> (i32, i32, i32) {
    %c0_i32 = arith.constant 0 : i32
    %c0_i32_0 = arith.constant 0 : i32
    %c0_i32_1 = arith.constant 0 : i32
    return %arg0, %c0_i32, %c0_i32_0 : i32, i32, i32
  }
  func.func @transform_2(%arg0: i32, %arg1: i32) -> (i32, i32, i32) {
    %c0_i32 = arith.constant 0 : i32
    %c0_i32_0 = arith.constant 0 : i32
    %c0_i32_1 = arith.constant 0 : i32
    return %arg0, %c0_i32, %c0_i32_0 : i32, i32, i32
  }
  func.func @transform_3(%arg0: i32, %arg1: i32) -> (i32, i32, i32, i32) {
    %c0_i32 = arith.constant 0 : i32
    %c0_i32_0 = arith.constant 0 : i32
    %c0_i32_1 = arith.constant 0 : i32
    return %arg0, %arg1, %c0_i32, %c0_i32_0 : i32, i32, i32, i32
  }
  func.func @transform_4(%arg0: i32, %arg1: i32) -> (i32, i32) {
    %c0_i32 = arith.constant 0 : i32
    %c0_i32_0 = arith.constant 0 : i32
    %c0_i32_1 = arith.constant 0 : i32
    return %c0_i32, %c0_i32_0 : i32, i32
  }
  func.func @transform_5(%arg0: i32, %arg1: i32) -> (i32, i32) {
    %c0_i32 = arith.constant 0 : i32
    %c0_i32_0 = arith.constant 0 : i32
    %c0_i32_1 = arith.constant 0 : i32
    return %c0_i32, %c0_i32_0 : i32, i32
  }
  func.func @transform_6(%arg0: i32, %arg1: i32) -> (i32, i32) {
    %c0_i32 = arith.constant 0 : i32
    %c0_i32_0 = arith.constant 0 : i32
    %c0_i32_1 = arith.constant 0 : i32
    return %c0_i32, %c0_i32_0 : i32, i32
  }
  func.func @transform_7(%arg0: i32, %arg1: i32) -> (i32, i32) {
    %c0_i32 = arith.constant 0 : i32
    %c0_i32_0 = arith.constant 0 : i32
    %c0_i32_1 = arith.constant 0 : i32
    return %c0_i32, %c0_i32_0 : i32, i32
  }
  func.func @transform_8(%arg0: i32, %arg1: i32) -> (i32, i32) {
    %c0_i32 = arith.constant 0 : i32
    %c0_i32_0 = arith.constant 0 : i32
    %c0_i32_1 = arith.constant 0 : i32
    return %c0_i32, %c0_i32_0 : i32, i32
  }
  func.func @transform_9(%arg0: i32, %arg1: i32) -> (i32, i32) {
    %c0_i32 = arith.constant 0 : i32
    %c0_i32_0 = arith.constant 0 : i32
    %c0_i32_1 = arith.constant 0 : i32
    return %c0_i32, %c0_i32_0 : i32, i32
  }
  func.func @transform_10(%arg0: i32, %arg1: i32) -> (i32, i32) {
    %c0_i32 = arith.constant 0 : i32
    %c0_i32_0 = arith.constant 0 : i32
    %c0_i32_1 = arith.constant 0 : i32
    return %c0_i32, %c0_i32_0 : i32, i32
  }
  func.func @transform_11(%arg0: i32, %arg1: i32) -> (i32, i32) {
    %c0_i32 = arith.constant 0 : i32
    %c0_i32_0 = arith.constant 0 : i32
    %c0_i32_1 = arith.constant 0 : i32
    return %c0_i32, %c0_i32_0 : i32, i32
  }
  func.func @transform_12(%arg0: i32, %arg1: i32) -> (i32, i32, i32) {
    %c0_i32 = arith.constant 0 : i32
    %c0_i32_0 = arith.constant 0 : i32
    return %arg0, %arg1, %c0_i32 : i32, i32, i32
  }
}

</mosaic_0001>

<bundles_post_ra>
// kernel: tpu_custom_call.1
= control target key start
LH: loop header
LB: loop body
LE: loop exit
PB: predicated region body
PF: predicated region fallthrough
CT: control target
= control target key end

     0   :  { %s3302_s0 = inlined_call_operand.hbm [shape: bf16[2,8,32], index: 0, kind: input, shape index: {}]   ;;  %s3303_s1 = inlined_call_operand.hbm [shape: bf16[2,8,32], index: 1, kind: input, shape index: {}]   ;;  %s3304_s2 = inlined_call_operand.hbm [shape: bf16[2,8,32], index: 2, kind: input, shape index: {}]   ;;  %s3305_s3 = inlined_call_operand.hbm [shape: bf16[2,1,8,8], index: 3, kind: input, shape index: {}]   ;;  %s3306_s4 = inlined_call_operand.hbm [shape: bf16[32,32], index: 4, kind: input, shape index: {}]   ;;  %s3307_s5 = inlined_call_operand.vmem [shape: f32[1,32], index: 5, kind: input, shape index: {}]   ;;  %s3308_s6 = inlined_call_operand.vmem [shape: bf16[32,32], index: 6, kind: input, shape index: {}]   ;;  %s3309_s7 = inlined_call_operand.vmem [shape: f32[1,32], index: 7, kind: input, shape index: {}]   ;;  %s3310_s8 = inlined_call_operand.hbm [shape: bf16[32,32], index: 8, kind: input, shape index: {}]   ;;  %s3311_s9 = inlined_call_operand.hbm [shape: f32[1,32], index: 9, kind: input, shape index: {}]   ;;  %s3312_s10 = inlined_call_operand.vmem [shape: bf16[32,32], index: 10, kind: input, shape index: {}]   ;;  %s3313_s11 = inlined_call_operand.vmem [shape: f32[1,32], index: 11, kind: input, shape index: {}]   ;;  %s3314_s12 = inlined_call_operand.hbm [shape: f32[2,8,32], index: 12, kind: output, shape index: {}]  }
   0x1   :  { %3334 = sst [smem:[#allocation30_spill]] %s3302_s0 }
   0x2   :  { %3335 = sst [smem:[#allocation31_spill]] %s3303_s1 }
   0x3   :  { %3336 = sst [smem:[#allocation32_spill]] %s3306_s4 }
   0x4   :  { %3337 = sst [smem:[#allocation33_spill]] %s3309_s7 }
   0x5   :  { %3338 = sst [smem:[#allocation34_spill]] %s3310_s8 }
   0x6   :  { %3339 = sst [smem:[#allocation35_spill]] %s3312_s10 }
   0x7   :  { %3340 = sst [smem:[#allocation36_spill]] %s3313_s11 }
   0x8   :  { %3341 = sst [smem:[#allocation37_spill]] %s3314_s12 }
   0x9   :  { %17 = vsyncpa [#allocation5], 0 }
   0xa   :  { %19 = vsyncpa [#allocation5 + $0x1], 0 }
   0xb   :  { %20 = vsyncpa [#allocation8], 0 }
   0xc   :  { %22 = vsyncpa [#allocation8 + $0x1], 0 }
   0xd   :  { %23 = vsyncpa [#allocation11], 0 }
   0xe   :  { %25 = vsyncpa [#allocation11 + $0x1], 0 }
   0xf   :  { %26 = vsyncpa [#allocation14], 0 }
  0x10   :  { %27 = vsyncpa [#allocation6], 0 }
  0x11   :  { %29 = vsyncpa [#allocation6 + $0x1], 0  ;;  %s2726_s21 = smov 0   ;;  %s2728_s22 = smov 0  }
  0x12   :  { %s2730_s23 = smov 0   ;;  %s2732_s24 = smov 0  }
  0x13   :  { %s2734_s25 = smov 0   ;;  %s2736_s26 = smov 0  }
  0x14 LB: > { %3342 = sst [smem:[#allocation23_spill]] %s2619_s21  ;;  %s2757_s27 = sadd.s32 4294967295, %s2639_s26   ;;  %s2639_s26 = sphi %s2736_s26, %s35_s26   ;;  %s2635_s25 = sphi %s2734_s25, %s3388_s25   ;;  %s2631_s24 = sphi %s2732_s24, %s3387_s24   ;;  %s2627_s23 = sphi %s2730_s23, %s3391_s23   ;;  %s2623_s22 = sphi %s2728_s22, %s3390_s22   ;;  %s2619_s21 = sphi %s2726_s21, %s3389_s21  }
  0x15   : > { %3343 = sst [smem:[#allocation24_spill]] %s2631_s24  ;;  %s2020_s28 = sadd.s32 4294967294, %s2639_s26  }
  0x16   : > { %3344 = sst [smem:[#allocation25_spill]] %s2635_s25  ;;  %p69_p0 = scmp.ne.s32.totalorder %s2623_s22, %s2619_s21 }
  0x17   : > { %p3318_p1 = scmp.eq.s32.totalorder %s2757_s27, 0  ;;  %p349_p3 = scmp.eq.s32.totalorder %s2020_s28, 1 }
  0x18   : > { %p2021_p5 = scmp.ge.s32.totalorder %s2639_s26, 1  ;;  %p356_p7 = scmp.lt.s32.totalorder %s2639_s26, 3 }
  0x19   : > { %p2766_p4 = por %p3318_p1, %p69_p0  ;;  %p2771_p6 = por %p349_p3, %p69_p0 }
  0x1a   : > { %p2776_p8 = pnand %p2021_p5, %p356_p7  ;;  %s2641_s14 = smov [#allocation12]  }
  0x1b   : > { %s3345_s29 = scalar_select %p2766_p4, 1, 0 }
  0x1c   : > { %s3346_s30 = scalar_select %p2771_p6, 1, 0 }
  0x1d   : > { %s3348_s13 = scalar_select %p2776_p8, 1, 0 }
  0x1e   : > { %3347 = sst [smem:[#allocation26_spill]] %s3346_s30  ;;  %s368_s15 = sshll.u32 %s2641_s14, 4  ;;  %s2780_s15 = int_to_ptr.vmem [resolvable:$true] %s368_s15 }
  0x1f   : > { %p2207_p9 = pneg %p2776_p8  ;;  %s2642_s17 = smov [#allocation13]  }
  0x20   : > { %s390_s18 = sshll.u32 %s2642_s17, 4  ;;  %s3350_s4 = sld [smem:[#allocation32_spill]]  ;;  %s2791_s18 = int_to_ptr.vmem [resolvable:$true] %s390_s18 }
  0x21   : > { %p2787_p11 = pnand %p2207_p9, %p3318_p1 }
  0x23   : > { %s3349_s16 = scalar_select %p2787_p11, 1, 0 }
  0x24   : > { %p2801_p13 = pneg %p2787_p11 }
  0x26   : > { %s2337_s28 = scalar_lea.hbm %s3350_s4, 256 }
  0x27   : > { %p2338_p12 = scmp.ne.s32.totalorder %s3350_s4, %s2337_s28  ;;  %p2344_p5 = scmp.lt.u32.totalorder %s2337_s28, %s3350_s4 }
  0x28   : > { %s3351_s21 = scalar_select %p2801_p13, 1, 0 }
  0x29   : > { %p2340_p0 = pnand %p2801_p13, %p2338_p12 }
  0x2b   : > { %p2341_p3 = pneg %p2340_p0 }
  0x2d   : > { %p2346_p7 = pnand %p2344_p5, %p2341_p3 }
  0x2f   : > { %2349 = shalt.err (!%p2346_p7)
}
  0x30   : > { %s2350_s30 = scalar_lea.vmem %s2780_s15, 256  ;;  %p2358_p2 = scmp.lt.s32.totalorder %s2780_s15, %s2780_s15 }
  0x31   : > { %p2351_p9 = scmp.ne.s32.totalorder %s2780_s15, %s2350_s30  ;;  %p2359_p6 = scmp.lt.s32.totalorder %s2350_s30, %s2350_s30 }
  0x33   : > { %p2353_p10 = pnand %p2351_p9, %p2801_p13  ;;  %p2360_p12 = por %p2359_p6, %p2358_p2 }
  0x35   : > { %p2354_p1 = pneg %p2353_p10 }
  0x37   : > { %p2361_p0 = pnand %p2360_p12, %p2354_p1 }
  0x39   : > { %2364 = shalt.err (!%p2361_p0)
}
  0x3a   : > { %s2643_s19 = smov 64   ;;  %s2644_s12 = smov 4  }
  0x3b   : > { %2210 = dma.hbm_to_vmem [thread:$0]  (!%p2787_p11), %s3350_s4, 256, %s2780_s15, [#allocation11], %s2643_s19, %s2643_s19, %s2644_s12  }
  0x3c   : > { %s3352_s8 = sld [smem:[#allocation34_spill]] }
  0x42   : > { %s2365_s11 = scalar_lea.hbm %s3352_s8, 256 }
  0x43   : > { %p2366_p2 = scmp.ne.s32.totalorder %s3352_s8, %s2365_s11  ;;  %p2372_p10 = scmp.lt.u32.totalorder %s2365_s11, %s3352_s8 }
  0x45   : > { %p2368_p1 = pnand %p2366_p2, %p2801_p13 }
  0x47   : > { %p2369_p6 = pneg %p2368_p1 }
  0x49   : > { %p2374_p3 = pnand %p2372_p10, %p2369_p6 }
  0x4b   : > { %2377 = shalt.err (!%p2374_p3)
}
  0x4c   : > { %s2378_s15 = scalar_lea.vmem %s2791_s18, 256  ;;  %p2386_p12 = scmp.lt.s32.totalorder %s2791_s18, %s2791_s18 }
  0x4d   : > { %p2379_p5 = scmp.ne.s32.totalorder %s2791_s18, %s2378_s15  ;;  %p2387_p0 = scmp.lt.s32.totalorder %s2378_s15, %s2378_s15 }
  0x4f   : > { %p2381_p7 = pnand %p2379_p5, %p2801_p13  ;;  %p2388_p2 = por %p2387_p0, %p2386_p12 }
  0x51   : > { %p2382_p9 = pneg %p2381_p7 }
  0x53   : > { %p2389_p1 = pnand %p2388_p2, %p2382_p9 }
  0x55   : > { %2392 = shalt.err (!%p2389_p1)
}
  0x56   : > { %2213 = dma.hbm_to_vmem [thread:$0]  (!%p2787_p11), %s3352_s8, 256, %s2791_s18, [#allocation14], %s2643_s19, %s2643_s19, %s2644_s12  }
  0x57   : > { %s47_s11 = sadd.s32 1, %s2635_s25  ;;  %s56_s24 = sadd.s32 1, %s2627_s23 }
  0x58   : > { %p49_p6 = scmp.ge.s32.totalorder %s47_s11, 2  ;;  %p63_p10 = scmp.ne.s32.totalorder %s2627_s23, %s2623_s22 }
  0x59   : > { %p64_p3 = scmp.eq.s32.totalorder %s2639_s26, 0  ;;  %p2237_p5 = scmp.lt.s32.totalorder %s2639_s26, 2 }
  0x5a   : > { %s3393_s11 = smov (%p49_p6, %s47_s11), 0  ;;  %p3354_p9 = scmp.eq.s32.totalorder %s2757_s27, 1 }
  0x5b   : > { %3353 = sst [smem:[#allocation27_spill]] %s3393_s11  ;;  %p65_p7 = por %p64_p3, %p63_p10 }
  0x5c   : > { %p2855_p12 = por %p3354_p9, %p63_p10  ;;  %s51_s28 = ssub.s32 %s2635_s25, %s3393_s11 }
  0x5d   : > { %s3320_s18 = sand.u32 1, %s2627_s23   ;;  %p54_p0 = scmp.eq.s32.totalorder %s51_s28, 0 }
  0x5e   : > { %s3355_s20 = scalar_select %p2855_p12, 1, 0 }
  0x5f   : > { %s2864_s19 = sshll.u32 %s3320_s18, 2  ;;  %s2867_s12 = sshll.u32 %s2635_s25, 6 }
  0x60   : > { %3356 = sst [smem:[#allocation28_spill]] %s3355_s20  ;;  %p2869_p2 = pnand %p2237_p5, %p65_p7 }
  0x61   : > { %s2874_s17 = scalar_select %p54_p0, %s2627_s23, %s56_s24  }
  0x62   : > { %s3357_s14 = scalar_select %p2869_p2, 1, 0 }
  0x63   : > { %3358 = sst [smem:[#allocation29_spill]] %s2874_s17  ;;  %s3325_s30 = sand.u32 1, %s2639_s26  }
  0x64   : > { %s3359_s1 = sld [smem:[#allocation31_spill]]  ;;  %s444_s28 = scalar_lea.vmem [#allocation7], %s2864_s19 }
  0x65   : > { %s451_s18 = sshll.u32 %s444_s28, 4  ;;  %s2888_s4 = scalar_lea.sflag [#allocation8], %s3325_s30  ;;  %s2884_s18 = int_to_ptr.vmem [resolvable:$true] %s451_s18 }
  0x66   : > { %p2894_p6 = pneg %p2869_p2 }
  0x6a   : > { %s2881_s10 = scalar_lea.hbm %s3359_s1, %s2867_s12  ;;  %s2398_s28 = scalar_lea.hbm %s3359_s1, 128 }
  0x6b   : > { %s2393_s8 = scalar_lea.hbm %s2881_s10, 64  ;;  %p2399_p5 = scmp.lt.u32.totalorder %s2881_s10, %s3359_s1 }
  0x6c   : > { %p2394_p1 = scmp.ne.s32.totalorder %s2881_s10, %s2393_s8  ;;  %p2400_p7 = scmp.lt.u32.totalorder %s2398_s28, %s2393_s8 }
  0x6d   : > { %p2402_p0 = scmp.lt.u32.totalorder %s2393_s8, %s2881_s10 }
  0x6e   : > { %p2396_p10 = pnand %p2894_p6, %p2394_p1  ;;  %p2401_p9 = por %p2400_p7, %p2399_p5 }
  0x70   : > { %p2397_p3 = pneg %p2396_p10  ;;  %p2403_p12 = por %p2402_p0, %p2401_p9 }
  0x72   : > { %p2404_p4 = pnand %p2403_p12, %p2397_p3 }
  0x74   : > { %2407 = shalt.err (!%p2404_p4)
}
  0x75   : > { %s2408_s30 = scalar_lea.vmem %s2884_s18, 64  ;;  %s2645_s15 = smov [#allocation7]  }
  0x76   : > { %p2409_p1 = scmp.ne.s32.totalorder %s2884_s18, %s2408_s30  ;;  %s2413_s7 = sshll.u32 %s2645_s15, 4  ;;  %s2414_s7 = int_to_ptr.vmem [resolvable:$false] %s2413_s7 }
  0x77   : > { %s2415_s25 = scalar_lea.vmem %s2414_s7, 128  ;;  %p2416_p11 = scmp.lt.s32.totalorder %s2884_s18, %s2414_s7 }
  0x78   : > { %p2411_p10 = pnand %p2409_p1, %p2894_p6  ;;  %p2417_p13 = scmp.lt.s32.totalorder %s2415_s25, %s2408_s30 }
  0x7a   : > { %p2412_p8 = pneg %p2411_p10  ;;  %p2418_p5 = por %p2417_p13, %p2416_p11 }
  0x7c   : > { %p2419_p7 = pnand %p2418_p5, %p2412_p8 }
  0x7e   : > { %2422 = shalt.err (!%p2419_p7)
}
  0x7f   : > { %2223 = dma.hbm_to_vmem [thread:$0]  (!%p2869_p2), %s2881_s10, 64, %s2884_s18, %s2888_s4  }
  0x80   : > { %s2646_s8 = smov [#allocation15]   ;;  %s3361_s0 = sld [smem:[#allocation30_spill]] }
  0x81   : > { %s404_s11 = sshll.u32 %s2646_s8, 4  ;;  %s2423_s25 = scalar_lea.hbm %s3311_s9, 16  ;;  %s405_s11 = int_to_ptr.vmem [resolvable:$true] %s404_s11 }
  0x82   : > { %p2424_p4 = scmp.ne.s32.totalorder %s3311_s9, %s2423_s25  ;;  %p3362_p8 = scmp.ne.s32.totalorder %s3351_s21, 0 }
  0x83   : > { %p2430_p12 = scmp.lt.u32.totalorder %s2423_s25, %s3311_s9 }
  0x84   : > { %p2426_p11 = pnand %p2424_p4, %p3362_p8 }
  0x86   : > { %s2922_s1 = scalar_lea.hbm %s3361_s0, %s2867_s12  ;;  %p2427_p13 = pneg %p2426_p11 }
  0x88   : > { %p2432_p3 = pnand %p2430_p12, %p2427_p13 }
  0x8a   : > { %2435 = shalt.err (!%p2432_p3)
}
  0x8b   : > { %s2436_s8 = scalar_lea.vmem %s405_s11, 16  ;;  %s2443_s28 = scalar_lea.vmem %s405_s11, 32 }
  0x8c   : > { %p2437_p9 = scmp.ne.s32.totalorder %s405_s11, %s2436_s8  ;;  %p2444_p10 = scmp.lt.s32.totalorder %s405_s11, %s405_s11 }
  0x8d   : > { %p2445_p5 = scmp.lt.s32.totalorder %s2443_s28, %s2436_s8 }
  0x8e   : > { %p2439_p0 = pnand %p2437_p9, %p3362_p8 }
  0x8f   : > { %p2446_p7 = por %p2445_p5, %p2444_p10 }
  0x90   : > { %p2440_p1 = pneg %p2439_p0 }
  0x92   : > { %p2447_p2 = pnand %p2446_p7, %p2440_p1 }
  0x94   : > { %2450 = shalt.err (!%p2447_p2)
}
  0x95   : > { %p3363_p4 = scmp.ne.s32.totalorder %s3349_s16, 0  ;;  %s425_s21 = scalar_lea.vmem [#allocation4], %s2864_s19 }
  0x96   : > { %s433_s15 = sshll.u32 %s425_s21, 4  ;;  %s2949_s16 = scalar_lea.hbm %s3304_s2, %s2867_s12  ;;  %s2943_s15 = int_to_ptr.vmem [resolvable:$true] %s433_s15 }
  0x97   : > { %2216 = dma.hbm_to_vmem [thread:$0]  (!%p3363_p4), %s3311_s9, 16, %s405_s11, [#allocation14]  }
  0x98   : > { %s3364_s25 = sand.u32 1, %s2627_s23   ;;  %s2451_s10 = scalar_lea.hbm %s2922_s1, 64 }
  0x99   : > { %s422_s18 = scalar_lea.sflag [#allocation5], %s3364_s25  ;;  %p2452_p2 = scmp.ne.s32.totalorder %s2922_s1, %s2451_s10 }
  0x9a   : > { %s2456_s11 = scalar_lea.hbm %s3361_s0, 128  ;;  %p2457_p13 = scmp.lt.u32.totalorder %s2922_s1, %s3361_s0 }
  0x9b   : > { %p2454_p8 = pnand %p2452_p2, %p2894_p6  ;;  %p2458_p12 = scmp.lt.u32.totalorder %s2456_s11, %s2451_s10 }
  0x9c   : > { %p2460_p9 = scmp.lt.u32.totalorder %s2451_s10, %s2922_s1 }
  0x9d   : > { %p2455_p11 = pneg %p2454_p8  ;;  %p2459_p3 = por %p2458_p12, %p2457_p13 }
  0x9f   : > { %p2461_p0 = por %p2460_p9, %p2459_p3 }
  0xa1   : > { %p2462_p1 = pnand %p2461_p0, %p2455_p11 }
  0xa3   : > { %2465 = shalt.err (!%p2462_p1)
}
  0xa4   : > { %s2466_s21 = scalar_lea.vmem %s2943_s15, 64  ;;  %s2647_s30 = smov [#allocation4]  }
  0xa5   : > { %p2467_p10 = scmp.ne.s32.totalorder %s2943_s15, %s2466_s21  ;;  %s2471_s7 = sshll.u32 %s2647_s30, 4  ;;  %s2472_s7 = int_to_ptr.vmem [resolvable:$false] %s2471_s7 }
  0xa6   : > { %s2473_s25 = scalar_lea.vmem %s2472_s7, 128  ;;  %p2474_p4 = scmp.lt.s32.totalorder %s2943_s15, %s2472_s7 }
  0xa7   : > { %p2469_p5 = pnand %p2467_p10, %p2894_p6  ;;  %p2475_p2 = scmp.lt.s32.totalorder %s2473_s25, %s2466_s21 }
  0xa9   : > { %p2470_p7 = pneg %p2469_p5  ;;  %p2476_p8 = por %p2475_p2, %p2474_p4 }
  0xab   : > { %p2477_p13 = pnand %p2476_p8, %p2470_p7 }
  0xad   : > { %2480 = shalt.err (!%p2477_p13)
}
  0xae   : > { %p3365_p11 = scmp.ne.s32.totalorder %s3357_s14, 0  ;;  %s462_s10 = scalar_lea.vmem [#allocation9], %s2864_s19 }
  0xaf   : > { %s469_s8 = sshll.u32 %s462_s10, 4  ;;  %s2979_s20 = scalar_lea.hbm %s3305_s3, %s2867_s12  ;;  %s470_s8 = int_to_ptr.vmem [resolvable:$true] %s469_s8 }
  0xb0   : > { %2220 = dma.hbm_to_vmem [thread:$0]  (!%p3365_p11), %s2922_s1, 64, %s2943_s15, %s422_s18  }
  0xb1   : > { %s2481_s17 = scalar_lea.hbm %s2949_s16, 64  ;;  %s2486_s7 = scalar_lea.hbm %s3304_s2, 128 }
  0xb2   : > { %p2482_p12 = scmp.ne.s32.totalorder %s2949_s16, %s2481_s17  ;;  %p2487_p0 = scmp.lt.u32.totalorder %s2949_s16, %s3304_s2 }
  0xb3   : > { %p2488_p1 = scmp.lt.u32.totalorder %s2486_s7, %s2481_s17  ;;  %p2490_p5 = scmp.lt.u32.totalorder %s2481_s17, %s2949_s16 }
  0xb4   : > { %p2484_p3 = pnand %p2482_p12, %p2894_p6 }
  0xb5   : > { %p2489_p10 = por %p2488_p1, %p2487_p0 }
  0xb6   : > { %p2485_p9 = pneg %p2484_p3 }
  0xb7   : > { %p2491_p7 = por %p2490_p5, %p2489_p10 }
  0xb9   : > { %p2492_p4 = pnand %p2491_p7, %p2485_p9 }
  0xbb   : > { %2495 = shalt.err (!%p2492_p4)
}
  0xbc   : > { %s2496_s1 = scalar_lea.vmem %s470_s8, 64  ;;  %s2648_s12 = smov [#allocation9]  }
  0xbd   : > { %p2497_p2 = scmp.ne.s32.totalorder %s470_s8, %s2496_s1  ;;  %s2501_s15 = sshll.u32 %s2648_s12, 4  ;;  %s2502_s15 = int_to_ptr.vmem [resolvable:$false] %s2501_s15 }
  0xbe   : > { %s2503_s18 = scalar_lea.vmem %s2502_s15, 128  ;;  %p2504_p12 = scmp.lt.s32.totalorder %s470_s8, %s2502_s15 }
  0xbf   : > { %p2499_p8 = pnand %p2497_p2, %p2894_p6  ;;  %p2505_p3 = scmp.lt.s32.totalorder %s2503_s18, %s2496_s1 }
  0xc1   : > { %p2500_p13 = pneg %p2499_p8  ;;  %p2506_p11 = por %p2505_p3, %p2504_p12 }
  0xc3   : > { %p2507_p0 = pnand %p2506_p11, %p2500_p13 }
  0xc5   : > { %2510 = shalt.err (!%p2507_p0)
}
  0xc6   : > { %p3366_p1 = scmp.ne.s32.totalorder %s3357_s14, 0  ;;  %s480_s0 = scalar_lea.vmem [#allocation10], %s2864_s19 }
  0xc7   : > { %s488_s10 = sshll.u32 %s480_s0, 4  ;;  %s3367_s28 = sand.u32 1, %s2639_s26   ;;  %s489_s10 = int_to_ptr.vmem [resolvable:$true] %s488_s10 }
  0xc8   : > { %2226 = dma.hbm_to_vmem [thread:$0]  (!%p3366_p1), %s2949_s16, 64, %s470_s8, %s2888_s4  }
  0xc9   : > { %s477_s11 = scalar_lea.sflag [#allocation11], %s3367_s28  ;;  %s2511_s17 = scalar_lea.hbm %s2979_s20, 64 }
  0xca   : > { %p2512_p11 = scmp.ne.s32.totalorder %s2979_s20, %s2511_s17  ;;  %s2516_s7 = scalar_lea.hbm %s3305_s3, 128 }
  0xcb   : > { %p2517_p5 = scmp.lt.u32.totalorder %s2979_s20, %s3305_s3  ;;  %p2518_p7 = scmp.lt.u32.totalorder %s2516_s7, %s2511_s17 }
  0xcc   : > { %p2514_p9 = pnand %p2512_p11, %p2894_p6  ;;  %p2520_p2 = scmp.lt.u32.totalorder %s2511_s17, %s2979_s20 }
  0xcd   : > { %p2519_p4 = por %p2518_p7, %p2517_p5 }
  0xce   : > { %p2515_p10 = pneg %p2514_p9 }
  0xcf   : > { %p2521_p8 = por %p2520_p2, %p2519_p4 }
  0xd1   : > { %p2522_p13 = pnand %p2521_p8, %p2515_p10 }
  0xd3   : > { %2525 = shalt.err (!%p2522_p13)
}
  0xd4   : > { %s2526_s4 = scalar_lea.vmem %s489_s10, 64  ;;  %s2649_s19 = smov [#allocation10]  }
  0xd5   : > { %p2527_p12 = scmp.ne.s32.totalorder %s489_s10, %s2526_s4  ;;  %s2531_s16 = sshll.u32 %s2649_s19, 4  ;;  %s2532_s16 = int_to_ptr.vmem [resolvable:$false] %s2531_s16 }
  0xd6   : > { %s2533_s8 = scalar_lea.vmem %s2532_s16, 128  ;;  %p2534_p11 = scmp.lt.s32.totalorder %s489_s10, %s2532_s16 }
  0xd7   : > { %p2529_p3 = pnand %p2527_p12, %p2894_p6  ;;  %p2535_p9 = scmp.lt.s32.totalorder %s2533_s8, %s2526_s4 }
  0xd9   : > { %p2530_p0 = pneg %p2529_p3  ;;  %p2536_p1 = por %p2535_p9, %p2534_p11 }
  0xdb   : > { %p2537_p5 = pnand %p2536_p1, %p2530_p0 }
  0xdd   : > { %2540 = shalt.err (!%p2537_p5)
}
  0xde   : > { %p3368_p7 = scmp.ne.s32.totalorder %s3357_s14, 0  ;;  %p3369_p10 = scmp.ne.s32.totalorder %s3348_s13, 0 }
  0xdf   : > { %s3022_s24 = sand.u32 (!%p3369_p10), 1, %s2623_s22   ;;  %p3370_p6 = scmp.ne.s32.totalorder (!%p3369_p10), %s3345_s29, 0 }
  0xe0   : > { %2229 = dma.hbm_to_vmem [thread:$0]  (!%p3368_p7), %s2979_s20, 64, %s489_s10, %s477_s11  }
  0xe1   : > { %497 = sbr.rel (%p3369_p10) target bundleno = 1680 (0x690), region = 68  ;;  %s3025_s12 = sshll.u32 (!%p3369_p10), %s3022_s24, 2 }
  0xe2   : > { %s500_s15 = scalar_lea.sflag (!%p3369_p10), [#allocation5], %s3022_s24  ;;  %s503_s18 = scalar_lea.vmem (!%p3369_p10), [#allocation4], %s3025_s12 }
  0xe8   : > { %2594 = dma.done.wait (%p3370_p6), %s500_s15, 64  }
  0xe9   : > { %2596 = vsyncadd (%p3370_p6), %s500_s15, 4294967232  ;;  %s508_s13 = sand.u32 1, %s2757_s27   ;;  %s512_s20 = scalar_lea.vmem [#allocation7], %s3025_s12 }
  0xea   : > { %s509_s14 = scalar_lea.sflag [#allocation8], %s508_s13 }
  0xeb   : > { %2598 = dma.done.wait (%p3370_p6), %s509_s14, 128  }
  0xec   : > { %2600 = vsyncadd (%p3370_p6), %s509_s14, 4294967168  ;;  %s521_s0 = scalar_lea.vmem [#allocation9], %s3025_s12  ;;  %s527_s10 = scalar_lea.sflag [#allocation11], %s508_s13 }
  0xed   : > { %s530_s28 = scalar_lea.vmem [#allocation10], %s3025_s12 }
  0xee   : > { %2602 = dma.done.wait (%p3370_p6), %s527_s10, 64  }
  0xef   : > { %2604 = vsyncadd (%p3370_p6), %s527_s10, 4294967232  ;;  %p3371_p1 = scmp.eq.s32.totalorder %s2757_s27, 0 }
  0xf1   : > { %2606 = dma.done.wait (%p3371_p1), [#allocation11], 256   ;;  %p3372_p4 = pmov %p3371_p1 }
  0xf2   : > { %p3373_p2 = pmov %p3371_p1 }
  0xf3   : > { %2608 = vsyncadd (%p3372_p4), [#allocation11], 4294967040 }
  0xf4   : > { %2610 = dma.done.wait (%p3373_p2), [#allocation14], 272   ;;  %p3374_p8 = pmov %p3371_p1 }
  0xf5   : > { %v2650_v0 = vmov 0.0   ;;  %vm2651_vm0 = vmmov 0   ;;  %v2305_v1 = vld [vmem:[%s3308_s6] sm:$0xff]   ;;  %v2306_v2 = vld [vmem:[%s3308_s6 + $0x8] sm:$0xff]   ;;  %vm627_vm1 = vcmask 261120   ;;  %v2309_v7 = vld [vmem:[#allocation13] sm:$0xff]   ;;  %v794_v32 = vlaneseq }
  0xf6   : > { %2612 = vsyncadd (%p3374_p8), [#allocation14], 4294967024  ;;  %2105 = vmatprep.subr.bf16.mxu0 %v2650_v0  ;;  %2109 = vmatprep.mubr.msk.bf16.mxu0 %vm2651_vm0, %v2650_v0  ;;  %v603_v3 = vld [vmem:[%s512_s20] sm:$0xf]  ;;  %v2307_v4 = vld [vmem:[#allocation12] sm:$0xff]   ;;  %s2652_s7 = smov 104  }
  0xf7   : > { %2113 = vmatprep.subr.bf16.mxu1 %v2650_v0  ;;  %2117 = vmatprep.mubr.msk.bf16.mxu1 %vm2651_vm0, %v2650_v0  ;;  %v2308_v5 = vld [vmem:[#allocation12 + $0x8] sm:$0xff]   ;;  %v933_v6 = vld [vmem:[%s503_s18] sm:$0xf]  ;;  %v2310_v8 = vld [vmem:[#allocation13 + $0x8] sm:$0xff]   ;;  %s2653_s25 = smov 120   ;;  %s2654_s1 = smov 112  }
  0xf8   : > { %2106 = vmatpush3.bf16.msra.mxu0 %v2305_v1  ;;  %2114 = vmatpush3.bf16.msra.mxu1 %v2309_v7  ;;  %v671_v9 = vld [vmem:[%s521_s0] sm:$0xf]  ;;  %v2053_v14 = vld [vmem:[%s3307_s5] ss:$0 sm:$0xff]  ;;  %s3375_s16 = sld [smem:[#allocation33_spill]]  ;;  %v795_v35 = vshrl.u32 %v794_v32, 7 }
  0xf9   : > { %2107 = vmatprep.subr.bf16.mxu0 %v2650_v0  ;;  %2115 = vmatprep.subr.bf16.mxu1 %v2650_v0  ;;  %v2047_v23 = vld [vmem:[#allocation15] ss:$0 sm:$0xff]  ;;  %v2655_v30 = vmov 1983009808   ;;  %v2656_v37 = vmov 1934713408  }
  0xfa   : > { %v792_v31 = vunpack.c.l.s4 %v2655_v30  ;;  %v824_v38 = vunpack.c.l.s4 %v2656_v37  ;;  %vm774_vm2 = vcmask 60416   ;;  %vm1162_vm3 = vcmask 1043456   ;;  %s3376_s15 = sld [smem:[#allocation35_spill]]  ;;  %s2657_s14 = smov 16  }
  0xfb   : > { %vm1158_vm4 = vcmask 64512   ;;  %s2658_s20 = smov 8   ;;  %s3377_s0 = sld [smem:[#allocation24_spill]]  ;;  %vm1757_vm5 = vcmask 130048   ;;  %vm1759_vm6 = vcmask 195584  }
  0xfc   : > { %2108 = vmatpush3.bf16.msra.mxu0 %v2306_v2  ;;  %2116 = vmatpush3.bf16.msra.mxu1 %v2310_v8  ;;  %v793_v34 = vunpack.c.0.s8 %v792_v31  ;;  %v825_v44 = vunpack.c.0.s8 %v824_v38  ;;  %s2659_s10 = smov 24   ;;  %s3378_s27 = sld [smem:[#allocation36_spill]] }
  0xfd   : > { %2121 = vmatprep.subr.bf16.mxu0 %v2650_v0  ;;  %2129 = vmatprep.subr.bf16.mxu1 %v2650_v0  ;;  %s3379_s17 = sld [smem:[#allocation28_spill]]  ;;  %s3380_s4 = sld [smem:[#allocation37_spill]] }
  0xfe   : > { %v2043_v21 = vld [vmem:[%s3375_s16] ss:$0 sm:$0xff]  ;;  %v3095_v41 = vsub.s32 %v793_v34, %v795_v35  ;;  %v3101_v49 = vsub.s32 %v825_v44, %v795_v35  ;;  %s1830_s16 = scalar_lea.sflag [#allocation6], %s3022_s24  ;;  %s2660_s12 = smov [#allocation16]  }
  0xff   : > { %2110 = vmatmul.mubr.msk.bf16.vlgmr.msra.gmra.mrb[0].mxu0 %vm627_vm1, %v603_v3  ;;  %2118 = vmatmul.mubr.msk.bf16.vlgmr.msra.gmra.mrb[0].mxu1 %vm627_vm1, %v671_v9  ;;  %s2545_s18 = sshll.u32 %s2660_s12, 4  ;;  %s2546_s18 = int_to_ptr.vmem [resolvable:$false] %s2545_s18 }
 0x100   : > { %2122 = vmatpush3.bf16.msra.mxu0 %v2307_v4  ;;  %2125 = vmatprep.mubr.msk.bf16.mxu0 %vm2651_vm0, %v2650_v0  ;;  %s2547_s13 = scalar_lea.vmem %s2546_s18, 256 }
 0x101   : > { %2123 = vmatprep.subr.bf16.mxu0 %v2650_v0  ;;  %2131 = vmatprep.mubr.msk.bf16.mxu1 %vm2651_vm0, %v2650_v0  ;;  %s2074_s21 = sshll.u32 %s3377_s0, 7 }
 0x103   : > { %s3252_s19 = scalar_lea.hbm %s3380_s4, %s2074_s21  ;;  %p3381_p12 = scmp.ne.s32.totalorder %s3379_s17, 0 }
 0x104   : > { %2124 = vmatpush3.bf16.msra.mxu0 %v2308_v5 }
 0x105   : > { %2135 = vmatprep.subr.bf16.mxu0 %v2650_v0 }
 0x107   : > { %2126 = vmatmul.mubr.msk.bf16.vlgmr.msra.gmra.mrb[4].mxu0 %vm627_vm1, %v933_v6 }
 0x108   : > { %2137 = vmatprep.mubr.msk.bf16.mxu0 %vm2651_vm0, %v2650_v0 }
 0x1d2   : > { %v665_v10 = vpop.f32.mrb[0].mxu0  ;;  %v732_v24 = vpop.f32.mrb[0].mxu1 }
 0x1d3   : > { %v2111_v11 = vpop.f32.mrb[1].mxu0  ;;  %v666_v22 = vadd.f32 %v2043_v21, %v665_v10  ;;  %v2119_v25 = vpop.f32.mrb[1].mxu1  ;;  %v3091_v26 = vadd.f32 %v2047_v23, %v732_v24 }
 0x1d4   : > { %v668_v12 = vpop.f32.mrb[2].mxu0  ;;  %v735_v27 = vpop.f32.mrb[2].mxu1 }
 0x1d5   : > { %v2112_v13 = vpop.f32.mrb[3].mxu0  ;;  %v2120_v28 = vpop.f32.mrb[3].mxu1 }
 0x1da   : > { %v995_v15 = vpop.f32.mrb[4].mxu0 }
 0x1db   : > { %v996_v16 = vadd.f32 %v2053_v14, %v995_v15  ;;  %v2127_v17 = vpop.f32.mrb[5].mxu0 }
 0x1dc   : > { %v998_v18 = vpop.f32.mrb[6].mxu0 }
 0x1dd   : > { %v1001_v19 = vmul.f32 0.35355338, %v996_v16  ;;  %v2128_v20 = vpop.f32.mrb[7].mxu0 }
 0x1df   : > { %1009 = vrot.lane.b32.xlu1 %v1001_v19, %s2652_s7  ;;  %1003 = vrot.lane.b32.xlu0 %v1001_v19, %s2653_s25 }
 0x1e3   : > { %1006 = vrot.lane.b32.xlu0 %v1001_v19, %s2654_s1 }
 0x1e7   : > { %780 = vrot.lane.b32.xlu0 %v3091_v26, %s2653_s25 }
 0x208   : > { %738 = vxpose.xlu1.b32.start.end [1/1] (short) (narrow) %v666_v22, 32 }
 0x232   : > { %783 = vrot.lane.b32.xlu1 %v3091_v26, %s2654_s1 }
 0x251   : > { %v1004_v29 = vpop.permute.xlu0 %1003  ;;  %v1010_v36 = vpop.permute.xlu1 %1009 }
 0x252   : > { %v1028_v42 = vcombine.low %v1004_v29, %v1010_v36  ;;  %v1029_v43 = vcombine.high %v1004_v29, %v1010_v36  ;;  %v1156_v36 = vld [vmem:[%s530_s28] sm:$0xf]  ;;  %s2042_s28 = sshll.u32 %s3022_s24, 3 }
 0x253   : > { %v1157_v37 = vunpack.c.l.bf16 %v1156_v36  ;;  %s597_s30 = scalar_lea.vmem [#allocation16], %s2042_s28 }
 0x254   : > { %v1036_v47 = vrot.slane %v1028_v42, %v3095_v41  ;;  %v1043_v48 = vrot.slane %v1029_v43, %v3095_v41 }
 0x255   : > { %v1007_v33 = vpop.permute.xlu0 %1006 }
 0x256   : > { %v1012_v39 = vcombine.low %v1001_v19, %v1007_v33  ;;  %v1013_v40 = vcombine.high %v1001_v19, %v1007_v33 }
 0x258   : > { %v1020_v45 = vrot.slane %v1012_v39, %v3095_v41  ;;  %v1027_v46 = vrot.slane %v1013_v40, %v3095_v41 }
 0x25a   : > { %v1044_v50 = vcombine.low %v1020_v45, %v1036_v47  ;;  %v1045_v51 = vcombine.high %v1020_v45, %v1036_v47  ;;  %v1060_v52 = vcombine.low %v1027_v46, %v1043_v48  ;;  %v1061_v53 = vcombine.high %v1027_v46, %v1043_v48 }
 0x25c   : > { %v1052_v54 = vrot.slane %v1044_v50, %v3101_v49  ;;  %v1059_v55 = vrot.slane %v1045_v51, %v3101_v49  ;;  %v1068_v56 = vrot.slane %v1060_v52, %v3101_v49  ;;  %v1075_v57 = vrot.slane %v1061_v53, %v3101_v49 }
 0x25e   : > { %v1080_v58 = vcombine.low %v1052_v54, %v1059_v55  ;;  %v2057_v59 = vcombine.high %v1052_v54, %v1059_v55  ;;  %v1096_v60 = vcombine.low %v1068_v56, %v1075_v57  ;;  %v2058_v61 = vcombine.high %v1068_v56, %v1075_v57 }
 0x260   : > { %v1087_v62 = vrot.slane %v1080_v58, %v3095_v41  ;;  %v1095_v63 = vrot.slane %v2057_v59, %v3095_v41  ;;  %v1103_v1 = vrot.slane %v1096_v60, %v3095_v41  ;;  %v1111_v2 = vrot.slane %v2058_v61, %v3095_v41 }
 0x262   : > { %v1112_v4 = vcombine.low %v1087_v62, %v1095_v63  ;;  %v1128_v5 = vcombine.low %v1103_v1, %v1111_v2  ;;  %v1113_v11 = vcombine.high %v1087_v62, %v1095_v63  ;;  %v1129_v13 = vcombine.high %v1103_v1, %v1111_v2  ;;  %v781_v1 = vpop.permute.xlu0 %780 }
 0x264   : > { %v1120_v9 = vrot.slane %v1112_v4, %v3101_v49  ;;  %v1136_v10 = vrot.slane %v1128_v5, %v3101_v49  ;;  %v1127_v19 = vrot.slane %v1113_v11, %v3101_v49  ;;  %v1143_v23 = vrot.slane %v1129_v13, %v3101_v49 }
 0x266   : > { %v1144_v15 = vcombine.low %v1120_v9, %v1136_v10  ;;  %v1145_v22 = vcombine.high %v1120_v9, %v1136_v10  ;;  %v1146_v28 = vcombine.low %v1127_v19, %v1143_v23  ;;  %v1147_v32 = vcombine.high %v1127_v19, %v1143_v23 }
 0x268   : > { %v1148_v21 = vpack.c.bf16 %v1144_v15, %v1144_v15  ;;  %v1149_v27 = vpack.c.bf16 %v1145_v22, %v1145_v22  ;;  %v1150_v31 = vpack.c.bf16 %v1146_v28, %v1146_v28  ;;  %v1151_v35 = vpack.c.bf16 %v1147_v32, %v1147_v32 }
 0x288   : > { %v754_v3 = vpop.trf.xlu1 }
 0x289   : > { %v770_v6 = vpack.c.bf16 %v754_v3, %v754_v3 }
 0x28b   : > { %775 = vst.msk [vmem:[#allocation2] sm:$0xf] %vm774_vm2, %v770_v6 }
 0x28c   : > { %v755_v7 = vpop.trf.xlu1 }
 0x28d   : > { %v771_v8 = vpack.c.bf16 %v755_v7, %v755_v7 }
 0x28f   : > { %776 = vst.msk [vmem:[#allocation2 + $0x4] sm:$0xf] %vm774_vm2, %v771_v8 }
 0x290   : > { %v756_v12 = vpop.trf.xlu1 }
 0x291   : > { %v772_v14 = vpack.c.bf16 %v756_v12, %v756_v12 }
 0x292   : > { %v1152_v16 = vld [vmem:[#allocation2] sm:$0xf] }
 0x293   : > { %777 = vst.msk [vmem:[#allocation2 + $0x8] sm:$0xf] %vm774_vm2, %v772_v14  ;;  %v1164_v17 = vsel %vm1162_vm3, %v1152_v16, 0 }
 0x294   : > { %2130 = vmatpush3.bf16.msra.mxu1 %v1164_v17  ;;  %v757_v18 = vpop.trf.xlu1 }
 0x295   : > { %v773_v20 = vpack.c.bf16 %v757_v18, %v757_v18  ;;  %2141 = vmatprep.subr.bf16.mxu1 %v2650_v0 }
 0x296   : > { %v1153_v24 = vld [vmem:[#allocation2 + $0x4] sm:$0xf] }
 0x297   : > { %778 = vst.msk [vmem:[#allocation2 + $0xc] sm:$0xf] %vm774_vm2, %v773_v20  ;;  %2132 = vmatmul.mubr.msk.bf16.vlgmr.msra.gmra.mrb[4].mxu1 %vm1158_vm4, %v1148_v21  ;;  %v1210_v25 = vsel %vm1162_vm3, %v1153_v24, 0 }
 0x298   : > { %2136 = vmatpush3.bf16.msra.mxu0 %v1210_v25  ;;  %2143 = vmatprep.mubr.msk.bf16.mxu1 %vm2651_vm0, %v2650_v0 }
 0x299   : > { %2147 = vmatprep.subr.bf16.mxu0 %v2650_v0 }
 0x29a   : > { %v1154_v29 = vld [vmem:[#allocation2 + $0x8] sm:$0xf] }
 0x29b   : > { %2138 = vmatmul.mubr.msk.bf16.vlgmr.msra.gmra.mrb[8].mxu0 %vm1158_vm4, %v1149_v27  ;;  %v1256_v30 = vsel %vm1162_vm3, %v1154_v29, 0 }
 0x29c   : > { %2142 = vmatpush3.bf16.msra.mxu1 %v1256_v30  ;;  %2149 = vmatprep.mubr.msk.bf16.mxu0 %vm2651_vm0, %v2650_v0 }
 0x29d   : > { %2153 = vmatprep.subr.bf16.mxu1 %v2650_v0 }
 0x29e   : > { %v1155_v33 = vld [vmem:[#allocation2 + $0xc] sm:$0xf] }
 0x29f   : > { %2144 = vmatmul.mubr.msk.bf16.vlgmr.msra.gmra.mrb[8].mxu1 %vm1158_vm4, %v1150_v31  ;;  %v1302_v34 = vsel %vm1162_vm3, %v1155_v33, 0 }
 0x2a0   : > { %2148 = vmatpush3.bf16.msra.mxu0 %v1302_v34  ;;  %2155 = vmatprep.mubr.msk.bf16.mxu1 %vm2651_vm0, %v2650_v0 }
 0x2a1   : > { %2159 = vmatprep.subr.bf16.mxu0 %v2650_v0 }
 0x2a3   : > { %2150 = vmatmul.mubr.msk.bf16.vlgmr.msra.gmra.mrb[12].mxu0 %vm1158_vm4, %v1151_v35 }
 0x2a4   : > { %2161 = vmatprep.mubr.msk.bf16.mxu0 %vm2651_vm0, %v2650_v0  ;;  %v784_v5 = vpop.permute.xlu1 %783 }
 0x2a5   : > { %v789_v9 = vcombine.low %v3091_v26, %v784_v5  ;;  %v790_v10 = vcombine.high %v3091_v26, %v784_v5 }
 0x2a7   : > { %v797_v16 = vrot.slane %v789_v9, %v3095_v41  ;;  %v804_v17 = vrot.slane %v790_v10, %v3095_v41 }
 0x36a   : > { %v1200_v38 = vpop.f32.mrb[4].mxu1 }
 0x36b   : > { %v1201_v39 = vadd.f32 %v1200_v38, %v1157_v37  ;;  %v2133_v40 = vpop.f32.mrb[5].mxu1 }
 0x36c   : > { %v1203_v42 = vpop.f32.mrb[6].mxu1 }
 0x36d   : > { %v2134_v43 = vpop.f32.mrb[7].mxu1  ;;  %v1344_v44 = vsel %vm1158_vm4, %v1201_v39, -inf }
 0x36e   : > { %1345 = vmax.xlane.f32.xlu0 %v1344_v44  ;;  %v1246_v45 = vpop.f32.mrb[8].mxu0 }
 0x36f   : > { %v1247_v46 = vadd.f32 %v1246_v45, %v1157_v37  ;;  %v2139_v47 = vpop.f32.mrb[9].mxu0 }
 0x370   : > { %v1249_v48 = vpop.f32.mrb[10].mxu0 }
 0x371   : > { %v2140_v50 = vpop.f32.mrb[11].mxu0  ;;  %v1347_v51 = vsel %vm1158_vm4, %v1247_v46, -inf }
 0x372   : > { %v1292_v52 = vpop.f32.mrb[8].mxu1  ;;  %1348 = vmax.xlane.f32.xlu0 %v1347_v51 }
 0x373   : > { %v2145_v53 = vpop.f32.mrb[9].mxu1  ;;  %v3149_v62 = vadd.f32 %v1292_v52, %v1157_v37 }
 0x374   : > { %v1295_v54 = vpop.f32.mrb[10].mxu1 }
 0x375   : > { %v2146_v55 = vpop.f32.mrb[11].mxu1  ;;  %v1350_v63 = vsel %vm1158_vm4, %v3149_v62, -inf }
 0x376   : > { %v1338_v56 = vpop.f32.mrb[12].mxu0 }
 0x377   : > { %v3143_v57 = vadd.f32 %v1338_v56, %v1157_v37  ;;  %v2151_v58 = vpop.f32.mrb[13].mxu0 }
 0x378   : > { %v1341_v59 = vpop.f32.mrb[14].mxu0 }
 0x379   : > { %v2152_v60 = vpop.f32.mrb[15].mxu0  ;;  %v1353_v61 = vsel %vm1158_vm4, %v3143_v57, -inf }
 0x37a   : > { %1354 = vmax.xlane.f32.xlu1 %v1353_v61 }
 0x388   : > { %786 = vrot.lane.b32.xlu0 %v3091_v26, %s2652_s7  ;;  %s1844_s7 = sshll.u32 %s597_s30, 4  ;;  %s3254_s7 = int_to_ptr.vmem [resolvable:$true] %s1844_s7 }
 0x389   : > { %s2541_s8 = scalar_lea.vmem %s3254_s7, 128  ;;  %p2548_p11 = scmp.lt.s32.totalorder %s3254_s7, %s2546_s18 }
 0x38a   : > { %p2542_p13 = scmp.ne.s32.totalorder %s3254_s7, %s2541_s8  ;;  %p2549_p9 = scmp.lt.s32.totalorder %s2547_s13, %s2541_s8 }
 0x38c   : > { %p2543_p3 = pnand %p2542_p13, %p3381_p12  ;;  %p2550_p5 = por %p2549_p9, %p2548_p11 }
 0x38e   : > { %p2544_p0 = pneg %p2543_p3 }
 0x390   : > { %p2551_p7 = pnand %p2550_p5, %p2544_p0 }
 0x3a7   : > { %1351 = vmax.xlane.f32.xlu0 %v1350_v63 }
 0x3fb   : > { %v3153_v2 = vpop.xlane.xlu0 %1345 }
 0x3fc   : > { %v1356_v3 = vmax.f32 %v3153_v2, -1e+30 }
 0x3fe   : > { %v1372_v4 = vsub.f32 %v1201_v39, %v1356_v3 }
 0x3ff   : > { %v3158_v6 = vpop.xlane.xlu0 %1348 }
 0x400   : > { %v1376_v7 = vmul.f32 1.442695, %v1372_v4  ;;  %v1357_v8 = vmax.f32 %v3158_v6, -1e+30 }
 0x402   : > { %v1373_v11 = vsub.f32 %v1247_v46, %v1357_v8  ;;  %2313 = vpow2.f32 %v1376_v7 }
 0x403   : > { %v787_v12 = vpop.permute.xlu0 %786 }
 0x404   : > { %v1378_v13 = vmul.f32 1.442695, %v1373_v11  ;;  %v805_v14 = vcombine.low %v781_v1, %v787_v12  ;;  %v806_v15 = vcombine.high %v781_v1, %v787_v12 }
 0x406   : > { %v813_v18 = vrot.slane %v805_v14, %v3095_v41  ;;  %v820_v19 = vrot.slane %v806_v15, %v3095_v41  ;;  %2315 = vpow2.f32 %v1378_v13 }
 0x407   : > { %v3177_v37 = vpop.xlane.xlu1 %1354 }
 0x408   : > { %v821_v20 = vcombine.low %v797_v16, %v813_v18  ;;  %v822_v21 = vcombine.high %v797_v16, %v813_v18  ;;  %v837_v26 = vcombine.low %v804_v17, %v820_v19  ;;  %v838_v22 = vcombine.high %v804_v17, %v820_v19 }
 0x409   : > { %v1359_v45 = vmax.f32 %v3177_v37, -1e+30 }
 0x40a   : > { %v829_v23 = vrot.slane %v821_v20, %v3101_v49  ;;  %v836_v24 = vrot.slane %v822_v21, %v3101_v49  ;;  %v845_v25 = vrot.slane %v837_v26, %v3101_v49  ;;  %v852_v27 = vrot.slane %v838_v22, %v3101_v49 }
 0x40b   : > { %v1375_v56 = vsub.f32 %v3143_v57, %v1359_v45 }
 0x40c   : > { %v857_v28 = vcombine.low %v829_v23, %v836_v24  ;;  %v2051_v29 = vcombine.high %v829_v23, %v836_v24  ;;  %v873_v30 = vcombine.low %v845_v25, %v852_v27  ;;  %v2052_v31 = vcombine.high %v845_v25, %v852_v27  ;;  %v2314_v32 = vpop.eup %2313 }
 0x40d   : > { %v1388_v38 = vsel %vm1158_vm4, %v2314_v32, 0.0  ;;  %v1382_v63 = vmul.f32 1.442695, %v1375_v56  ;;  %v1404_v10 = vpack.c.bf16 %v2314_v32, %v2314_v32  ;;  %v1360_v23 = vsub.f32 -1e+30, %v1356_v3 }
 0x40e   : > { %v864_v33 = vrot.slane %v857_v28, %v3095_v41  ;;  %v872_v34 = vrot.slane %v2051_v29, %v3095_v41  ;;  %v880_v35 = vrot.slane %v873_v30, %v3095_v41  ;;  %v888_v36 = vrot.slane %v2052_v31, %v3095_v41  ;;  %1389 = vadd.xlane.f32.xlu0 %v1388_v38 }
 0x40f   : > { %2317 = vpow2.f32 %v1382_v63  ;;  %v1364_v24 = vmul.f32 1.442695, %v1360_v23  ;;  %v1363_v27 = vsub.f32 -1e+30, %v1359_v45 }
 0x410   : > { %v889_v39 = vcombine.low %v864_v33, %v872_v34  ;;  %v890_v40 = vcombine.high %v864_v33, %v872_v34  ;;  %v905_v42 = vcombine.low %v880_v35, %v888_v36  ;;  %v906_v43 = vcombine.high %v880_v35, %v888_v36  ;;  %v2316_v44 = vpop.eup %2315 }
 0x411   : > { %v1391_v51 = vsel %vm1158_vm4, %v2316_v44, 0.0  ;;  %v1405_v11 = vpack.c.bf16 %v2316_v44, %v2316_v44  ;;  %v1370_v28 = vmul.f32 1.442695, %v1363_v27 }
 0x412   : > { %v897_v46 = vrot.slane %v889_v39, %v3101_v49  ;;  %v904_v47 = vrot.slane %v890_v40, %v3101_v49  ;;  %v913_v48 = vrot.slane %v905_v42, %v3101_v49  ;;  %v920_v50 = vrot.slane %v906_v43, %v3101_v49  ;;  %1392 = vadd.xlane.f32.xlu0 %v1391_v51 }
 0x414   : > { %v921_v52 = vcombine.low %v897_v46, %v913_v48  ;;  %v922_v53 = vcombine.high %v897_v46, %v913_v48  ;;  %v923_v54 = vcombine.low %v904_v47, %v920_v50  ;;  %v924_v55 = vcombine.high %v904_v47, %v920_v50 }
 0x416   : > { %v925_v58 = vpack.c.bf16 %v921_v52, %v921_v52  ;;  %v926_v59 = vpack.c.bf16 %v922_v53, %v922_v53  ;;  %v927_v60 = vpack.c.bf16 %v923_v54, %v923_v54  ;;  %v928_v61 = vpack.c.bf16 %v924_v55, %v924_v55 }
 0x418   : > { %929 = vst.msk [vmem:[#allocation3] sm:$0xf] %vm774_vm2, %v925_v58  ;;  %930 = vst.msk [vmem:[#allocation3 + $0x4] sm:$0xf] %vm774_vm2, %v926_v59 }
 0x419   : > { %931 = vst.msk [vmem:[#allocation3 + $0x8] sm:$0xf] %vm774_vm2, %v927_v60  ;;  %932 = vst.msk [vmem:[#allocation3 + $0xc] sm:$0xf] %vm774_vm2, %v928_v61  ;;  %v2318_v14 = vpop.eup %2317 }
 0x41a   : > { %v1407_v15 = vpack.c.bf16 %v2318_v14, %v2318_v14  ;;  %v1397_v22 = vsel %vm1158_vm4, %v2318_v14, 0.0 }
 0x41f   : > { %v1408_v1 = vld [vmem:[#allocation3] sm:$0xf]  ;;  %v1409_v4 = vld [vmem:[#allocation3 + $0x4] sm:$0xf] }
 0x420   : > { %v1416_v5 = vsel %vm1162_vm3, %v1408_v1, 0  ;;  %v1462_v57 = vsel %vm1162_vm3, %v1409_v4, 0  ;;  %v1410_v7 = vld [vmem:[#allocation3 + $0x8] sm:$0xf]  ;;  %v1411_v9 = vld [vmem:[#allocation3 + $0xc] sm:$0xf] }
 0x421   : > { %2154 = vmatpush3.bf16.msra.mxu1 %v1416_v5  ;;  %2160 = vmatpush3.bf16.msra.mxu0 %v1462_v57  ;;  %v1508_v12 = vsel %vm1162_vm3, %v1410_v7, 0  ;;  %v1554_v13 = vsel %vm1162_vm3, %v1411_v9, 0 }
 0x422   : > { %2165 = vmatprep.subr.bf16.mxu1 %v2650_v0  ;;  %2171 = vmatprep.subr.bf16.mxu0 %v2650_v0 }
 0x424   : > { %2156 = vmatmul.mubr.msk.bf16.vlgmr.msra.gmra.mrb[12].mxu1 %vm1158_vm4, %v1404_v10  ;;  %2162 = vmatmul.mubr.msk.bf16.vlgmr.msra.gmra.mrb[16].mxu0 %vm1158_vm4, %v1405_v11 }
 0x425   : > { %2166 = vmatpush3.bf16.msra.mxu1 %v1508_v12  ;;  %2172 = vmatpush3.bf16.msra.mxu0 %v1554_v13 }
 0x426   : > { %2173 = vmatprep.mubr.msk.bf16.mxu0 %vm2651_vm0, %v2650_v0  ;;  %2167 = vmatprep.mubr.msk.bf16.mxu1 %vm2651_vm0, %v2650_v0 }
 0x427   : > { %2177 = vmatprep.subr.bf16.mxu1 %v2650_v0 }
 0x42c   : > { %2174 = vmatmul.mubr.msk.bf16.vlgmr.msra.gmra.mrb[20].mxu0 %vm1158_vm4, %v1407_v15 }
 0x434   : > { %v1352_v16 = vpop.xlane.xlu0 %1351 }
 0x435   : > { %v1358_v17 = vmax.f32 %v1352_v16, -1e+30 }
 0x437   : > { %v1374_v18 = vsub.f32 %v3149_v62, %v1358_v17  ;;  %v1361_v62 = vsub.f32 -1e+30, %v1357_v8  ;;  %v1362_v47 = vsub.f32 -1e+30, %v1358_v17 }
 0x439   : > { %v1380_v19 = vmul.f32 1.442695, %v1374_v18  ;;  %v1366_v25 = vmul.f32 1.442695, %v1361_v62  ;;  %v1368_v55 = vmul.f32 1.442695, %v1362_v47 }
 0x43b   : > { %2319 = vpow2.f32 %v1380_v19 }
 0x43c   : > { %2321 = vpow2.f32 %v1364_v24 }
 0x43d   : > { %2323 = vpow2.f32 %v1366_v25  ;;  %v2311_v25 = vld [vmem:[%s3376_s15] sm:$0xff]  }
 0x43e   : > { %2325 = vpow2.f32 %v1370_v28 }
 0x445   : > { %v2320_v20 = vpop.eup %2319 }
 0x446   : > { %v1394_v21 = vsel %vm1158_vm4, %v2320_v20, 0.0  ;;  %v1406_v26 = vpack.c.bf16 %v2320_v20, %v2320_v20  ;;  %v2322_v30 = vpop.eup %2321 }
 0x447   : > { %1395 = vadd.xlane.f32.xlu0 %v1394_v21  ;;  %v2324_v31 = vpop.eup %2323  ;;  %v1384_v33 = vmul.f32 0.0, %v2322_v30 }
 0x448   : > { %2168 = vmatmul.mubr.msk.bf16.vlgmr.msra.gmra.mrb[16].mxu1 %vm1158_vm4, %v1406_v26  ;;  %v1385_v34 = vmul.f32 0.0, %v2324_v31  ;;  %v2326_v6 = vpop.eup %2325 }
 0x449   : > { %2181 = vmatprep.mubr.msk.bf16.mxu1 %vm2651_vm0, %v2650_v0  ;;  %v1387_v36 = vmul.f32 0.0, %v2326_v6  ;;  %2178 = vmatpush3.bf16.msra.mxu1 %v2311_v25 }
 0x44a   : > { %2179 = vmatprep.subr.bf16.mxu1 %v2650_v0 }
 0x44b   : > { %1398 = vadd.xlane.f32.xlu0 %v1397_v22 }
 0x49b   : > { %v1390_v29 = vpop.xlane.xlu0 %1389 }
 0x49c   : > { %v1400_v2 = vadd.f32 %v1390_v29, %v1384_v33 }
 0x49e   : > { %2327 = vrcp.f32 %v1400_v2  ;;  %v2312_v2 = vld [vmem:[%s3376_s15 + $0x8] sm:$0xff]  }
 0x49f   : > { %v1393_v32 = vpop.xlane.xlu0 %1392  ;;  %2180 = vmatpush3.bf16.msra.mxu1 %v2312_v2 }
 0x4a0   : > { %v1401_v35 = vadd.f32 %v1393_v32, %v1385_v34 }
 0x4a2   : > { %2329 = vrcp.f32 %v1401_v35 }
 0x4a8   : > { %v2328_v40 = vpop.eup %2327 }
 0x4ac   : > { %v2330_v46 = vpop.eup %2329 }
 0x4d4   : > { %v1396_v3 = vpop.xlane.xlu0 %1395 }
 0x4d8   : > { %v1399_v8 = vpop.xlane.xlu0 %1398 }
 0x4d9   : > { %v1403_v38 = vadd.f32 %v1399_v8, %v1387_v36 }
 0x4db   : > { %2331 = vrcp.f32 %v1403_v38 }
 0x4dc   : > { %2333 = vpow2.f32 %v1368_v55 }
 0x4e5   : > { %v2332_v60 = vpop.eup %2331 }
 0x4e6   : > { %v2334_v57 = vpop.eup %2333 }
 0x4e7   : > { %v1386_v7 = vmul.f32 0.0, %v2334_v57 }
 0x4e9   : > { %v1402_v9 = vadd.f32 %v1396_v3, %v1386_v7 }
 0x4eb   : > { %2335 = vrcp.f32 %v1402_v9 }
 0x4f5   : > { %v2336_v13 = vpop.eup %2335 }
 0x4f7   : > { %v1452_v37 = vpop.f32.mrb[12].mxu1  ;;  %v1498_v39 = vpop.f32.mrb[16].mxu0 }
 0x4f8   : > { %v1596_v42 = vadd.f32 %v1452_v37, %v1384_v33  ;;  %v1597_v43 = vadd.f32 %v1498_v39, %v1385_v34  ;;  %v2157_v44 = vpop.f32.mrb[13].mxu1  ;;  %v2163_v45 = vpop.f32.mrb[17].mxu0 }
 0x4f9   : > { %v1455_v48 = vpop.f32.mrb[14].mxu1  ;;  %v1501_v50 = vpop.f32.mrb[18].mxu0 }
 0x4fa   : > { %v1604_v51 = vmul.f32 %v2328_v40, %v1596_v42  ;;  %v1605_v52 = vmul.f32 %v2330_v46, %v1597_v43  ;;  %v2158_v53 = vpop.f32.mrb[15].mxu1  ;;  %v2164_v54 = vpop.f32.mrb[19].mxu0 }
 0x4fb   : > { %v2069_v54 = vld [vmem:[%s3378_s27] ss:$0 sm:$0xff] }
 0x4ff   : > { %v1590_v56 = vpop.f32.mrb[20].mxu0 }
 0x500   : > { %v1599_v58 = vadd.f32 %v1590_v56, %v1387_v36  ;;  %v2175_v59 = vpop.f32.mrb[21].mxu0 }
 0x501   : > { %v1593_v61 = vpop.f32.mrb[22].mxu0 }
 0x502   : > { %v1607_v63 = vmul.f32 %v2332_v60, %v1599_v58  ;;  %v2176_v1 = vpop.f32.mrb[23].mxu0 }
 0x504   : > { %v1624_v4 = vcombine.low %v1605_v52, %v1607_v63  ;;  %v1625_v5 = vcombine.high %v1605_v52, %v1607_v63 }
 0x506   : > { %v1632_v19 = vrot.slane %v1624_v4, %v3095_v41  ;;  %v1639_v20 = vrot.slane %v1625_v5, %v3095_v41 }
 0x51b   : > { %v1544_v10 = vpop.f32.mrb[16].mxu1 }
 0x51c   : > { %v1598_v11 = vadd.f32 %v1544_v10, %v1386_v7  ;;  %v2169_v12 = vpop.f32.mrb[17].mxu1 }
 0x51d   : > { %v1547_v14 = vpop.f32.mrb[18].mxu1 }
 0x51e   : > { %v1606_v15 = vmul.f32 %v2336_v13, %v1598_v11  ;;  %v2170_v16 = vpop.f32.mrb[19].mxu1 }
 0x520   : > { %v1608_v17 = vcombine.low %v1604_v51, %v1606_v15  ;;  %v1609_v18 = vcombine.high %v1604_v51, %v1606_v15 }
 0x522   : > { %v1616_v21 = vrot.slane %v1608_v17, %v3095_v41  ;;  %v1623_v26 = vrot.slane %v1609_v18, %v3095_v41 }
 0x524   : > { %v1640_v22 = vcombine.low %v1616_v21, %v1632_v19  ;;  %v1641_v23 = vcombine.high %v1616_v21, %v1632_v19  ;;  %v1656_v62 = vcombine.low %v1623_v26, %v1639_v20  ;;  %v1657_v24 = vcombine.high %v1623_v26, %v1639_v20 }
 0x526   : > { %v1648_v27 = vrot.slane %v1640_v22, %v3101_v49  ;;  %v1655_v28 = vrot.slane %v1641_v23, %v3101_v49  ;;  %v1664_v29 = vrot.slane %v1656_v62, %v3101_v49  ;;  %v1671_v30 = vrot.slane %v1657_v24, %v3101_v49 }
 0x528   : > { %v1676_v31 = vcombine.low %v1648_v27, %v1655_v28  ;;  %v2067_v32 = vcombine.high %v1648_v27, %v1655_v28  ;;  %v1692_v33 = vcombine.low %v1664_v29, %v1671_v30  ;;  %v2068_v34 = vcombine.high %v1664_v29, %v1671_v30 }
 0x52a   : > { %v1683_v3 = vrot.slane %v1676_v31, %v3095_v41  ;;  %v1691_v35 = vrot.slane %v2067_v32, %v3095_v41  ;;  %v1699_v6 = vrot.slane %v1692_v33, %v3095_v41  ;;  %v1707_v8 = vrot.slane %v2068_v34, %v3095_v41 }
 0x52c   : > { %v1709_v36 = vcombine.high %v1683_v3, %v1691_v35  ;;  %v1725_v38 = vcombine.high %v1699_v6, %v1707_v8  ;;  %v1708_v37 = vcombine.low %v1683_v3, %v1691_v35  ;;  %v1724_v39 = vcombine.low %v1699_v6, %v1707_v8 }
 0x52e   : > { %v1723_v40 = vrot.slane %v1709_v36, %v3101_v49  ;;  %v1739_v0 = vrot.slane %v1725_v38, %v3101_v49  ;;  %v1716_v42 = vrot.slane %v1708_v37, %v3101_v49  ;;  %v1732_v43 = vrot.slane %v1724_v39, %v3101_v49 }
 0x530   : > { %v1742_v44 = vcombine.low %v1723_v40, %v1739_v0  ;;  %v1741_v45 = vcombine.high %v1716_v42, %v1732_v43  ;;  %v1743_v46 = vcombine.high %v1723_v40, %v1739_v0  ;;  %v1740_v47 = vcombine.low %v1716_v42, %v1732_v43 }
 0x532   : > { %1749 = vrot.lane.b32.xlu1 %v1742_v44, %s2657_s14  ;;  %1745 = vrot.lane.b32.xlu0 %v1741_v45, %s2658_s20 }
 0x536   : > { %1753 = vrot.lane.b32.xlu0 %v1743_v46, %s2659_s10 }
 0x5a4   : > { %v1746_v41 = vpop.permute.xlu0 %1745  ;;  %v1750_v48 = vpop.permute.xlu1 %1749 }
 0x5a5   : > { %v1756_v50 = vsel %vm1158_vm4, %v1740_v47, %v1746_v41 }
 0x5a6   : > { %v1758_v49 = vsel %vm1757_vm5, %v1756_v50, %v1750_v48 }
 0x5a8   : > { %v1754_v51 = vpop.permute.xlu0 %1753 }
 0x5a9   : > { %v1760_v52 = vsel %vm1759_vm6, %v1758_v49, %v1754_v51 }
 0x5aa   : > { %v1761_v53 = vpack.c.bf16 %v1760_v52, %v1760_v52 }
 0x5ac   : > { %2182 = vmatmul.mubr.msk.bf16.vlgmr.msra.gmra.mrb[20].mxu1 %vm627_vm1, %v1761_v53 }
 0x67f   : > { %v1822_v55 = vpop.f32.mrb[20].mxu1 }
 0x680   : > { %v1823_v56 = vadd.f32 %v2069_v54, %v1822_v55  ;;  %v2183_v58 = vpop.f32.mrb[21].mxu1 }
 0x681   : > { %v1825_v59 = vpop.f32.mrb[22].mxu1 }
 0x682   : > { %v2184_v60 = vpop.f32.mrb[23].mxu1  ;;  %1828 = vst.msk [vmem:[%s597_s30] sm:$0xff] %vm627_vm1, %v1823_v56 }
 0x683   : > { %2554 = shalt.err (!%p2551_p7)
}
 0x684   : > { %s2555_s24 = scalar_lea.hbm %s3252_s19, 128  ;;  %s2559_s0 = scalar_lea.hbm %s3380_s4, 256 }
 0x685   : > { %p2556_p10 = scmp.ne.s32.totalorder %s3252_s19, %s2555_s24  ;;  %p2560_p4 = scmp.lt.u32.totalorder %s3252_s19, %s3380_s4 }
 0x686   : > { %p2561_p2 = scmp.lt.u32.totalorder %s2559_s0, %s2555_s24  ;;  %p2563_p13 = scmp.lt.u32.totalorder %s2555_s24, %s3252_s19 }
 0x687   : > { %p2557_p6 = pnand %p2556_p10, %p3381_p12 }
 0x688   : > { %p2562_p8 = por %p2561_p2, %p2560_p4 }
 0x689   : > { %p2558_p1 = pneg %p2557_p6 }
 0x68a   : > { %p2564_p3 = por %p2563_p13, %p2562_p8 }
 0x68c   : > { %p2565_p0 = pnand %p2564_p3, %p2558_p1 }
 0x68e   : > { %2568 = shalt.err (!%p2565_p0)
}
 0x68f   : > { %2205 = dma.vmem_to_hbm [thread:$0]  (%p3381_p12), %s3254_s7, 128, %s3252_s19, %s1830_s16  }
 0x690 PF: > { %s3382_s29 = sld [smem:[#allocation23_spill]]  ;;  %s3383_s11 = sld [smem:[#allocation26_spill]] }
 0x691   : > { %p3385_p9 = scmp.ge.s32.totalorder %s2639_s26, 2 }
 0x696   : > { %s1856_s27 = sand.u32 1, %s3382_s29   ;;  %p3384_p11 = scmp.ne.s32.totalorder %s3383_s11, 0 }
 0x697   : > { %s1857_s21 = scalar_lea.sflag [#allocation6], %s1856_s27 }
 0x698   : > { %p2231_p5 = pnand %p3385_p9, %p3384_p11 }
 0x69a   : > { %2614 = dma.done.wait (!%p2231_p5), %s1857_s21, 128  }
 0x69b   : > { %2616 = vsyncadd (!%p2231_p5), %s1857_s21, 4294967168  ;;  %s35_s26 = sadd.s32 1, %s2639_s26   ;;  %s3386_s17 = sld [smem:[#allocation29_spill]] }
 0x69c   : > { %p32_p7 = scmp.ge.s32.totalorder %s35_s26, 4   ;;  %s3387_s24 = sld [smem:[#allocation25_spill]] }
 0x69d   : > { %s3388_s25 = sld [smem:[#allocation27_spill]]  ;;  %s3389_s21 = smov %s2623_s22 }
 0x69e   : > { %s3390_s22 = smov %s2627_s23  ;;  %34 = sbr.rel (!%p32_p7) target bundleno = 20 (0x14), region = 166 }
 0x6a1   : > { %s3391_s23 = smov %s3386_s17 }
 0x6a5   :  { %1862 = vsyncpa [#allocation5], 1 }
 0x6a6   :  { %1864 = vsyncpa [#allocation5 + $0x1], 1 }
 0x6a7   :  { %1865 = vsyncpa [#allocation8], 1 }
 0x6a8   :  { %1867 = vsyncpa [#allocation8 + $0x1], 1 }
 0x6a9   :  { %1868 = vsyncpa [#allocation11], 1 }
 0x6aa   :  { %1870 = vsyncpa [#allocation11 + $0x1], 1 }
 0x6ab   :  { %1871 = vsyncpa [#allocation14], 1 }
 0x6ac   :  { %1872 = vsyncpa [#allocation6], 1 }
 0x6ad   :  { %1874 = vsyncpa [#allocation6 + $0x1], 1 }

</bundles_post_ra>
